<compile_context>
chip_gen: v7x
topology: tpu7x:2x2x1
jax: 0.10.0
libtpu: 0.0.40
codegen_flags: <defaults>
</compile_context>

<pallas_src>
import functools

import numpy as np
import jax
import jax.numpy as jnp
from jax import lax
from jax.experimental import pallas as pl
from jax.experimental.pallas import tpu as pltpu


# --------------------------------- kernel ----------------------------------- #

def _res_block_down_kernel(xpad_ref, w1_ref, b1_ref, w2_ref, b2_ref, wl_ref, bl_ref,
                           pool_ref, out_ref, ypad_ref, acc1_ref, acc2_ref,
                           *, H, W, G):
    """All activations live in the flat "strided interior" layout: a (C, Hp*Wp)
    reflection-padded image, so every 3x3 tap is one contiguous lane slice of
    length L = (H-1)*Wp + W (columns j >= W inside a row are junk lanes that the
    pooling matrix masks with zeros)."""
    f32 = jnp.float32
    Wp, Wh = W + 2, W // 2
    L = (H - 1) * Wp + W
    S = (2 * G - 1) * Wp + W               # flat span of one pooling group
    n_groups = (H // 2) // G

    # ---- residual 1x1 conv on RAW x (centre tap of the padded block).  The conv2
    # ---- and shortcut biases are folded into this "total" accumulator up front.
    acc2_ref[...] = (jnp.dot(wl_ref[...], xpad_ref[0, :, Wp + 1:Wp + 1 + L],
                             preferred_element_type=f32)
                     + bl_ref[...] + b2_ref[...])

    # ---- ReLU once, in place, on the padded x block (commutes with reflection) ----
    xpad_ref[0, :, :] = jnp.maximum(xpad_ref[0, :, :], 0.0)

    # ---- conv_r1: 9 accumulating per-tap dots (no materialized im2col slab) ----
    acc1_ref[...] = (jnp.dot(w1_ref[0], xpad_ref[0, :, 0:L],
                             preferred_element_type=f32) + b1_ref[...])
    for k in range(1, 9):
        ky, kx = k // 3, k % 3
        off = ky * Wp + kx
        acc1_ref[...] += jnp.dot(w1_ref[k], xpad_ref[0, :, off:off + L],
                                 preferred_element_type=f32)

    # ---- relu(conv1) -> reflection-padded VMEM buffer (never touches HBM) ----
    # One bulk store fills the whole interior; the junk it writes into border slots
    # is overwritten by the border fill below.
    ypad_ref[:, Wp + 1:Wp + 1 + L] = jnp.maximum(acc1_ref[...], 0.0)
    # top / bottom reflected rows: bulk copies
    ypad_ref[:, 1:W + 1] = ypad_ref[:, 2 * Wp + 1:2 * Wp + 1 + W]
    ypad_ref[:, (H + 1) * Wp + 1:(H + 1) * Wp + 1 + W] = \
        ypad_ref[:, (H - 1) * Wp + 1:(H - 1) * Wp + 1 + W]
    # left / right reflected columns (incl. corners, done after the row fills)
    # TODO(synk): at production H use strided stores / a fori_loop instead of this
    #             trace-time loop of one-lane copies.
    for r in range(H + 2):
        b = r * Wp
        ypad_ref[:, b:b + 1] = ypad_ref[:, b + 2:b + 3]
        ypad_ref[:, b + W + 1:b + W + 2] = ypad_ref[:, b + W - 1:b + W]

    # ---- conv_r2: 9 accumulating per-tap dots into the same total accumulator ----
    for k in range(9):
        ky, kx = k // 3, k % 3
        off = ky * Wp + kx
        acc2_ref[...] += jnp.dot(w2_ref[k], ypad_ref[:, off:off + L],
                                 preferred_element_type=f32)

    # ---- avg_pool2d(2): one constant-matrix dot per group of G row pairs;
    # ---- each group emits a single G*W/2-lane store (lane-dense output slab).
    for g in range(n_groups):
        base = 2 * g * G * Wp
        pooled = jnp.dot(acc2_ref[:, base:base + S], pool_ref[...],
                         preferred_element_type=f32)
        out_ref[0, :, g * G * Wh:(g + 1) * G * Wh] = pooled.astype(out_ref.dtype)


# ------------------------------ pallas_call glue ----------------------------- #

def _vmem_limit_bytes():
    """~7/8 of physical VMEM (<=112 MiB); falls back to the 32 MiB scoped default."""
    try:
        cap = int(pltpu.get_tpu_info().vmem_capacity_bytes)
        return int(min(cap - cap // 8, 112 * 1024 * 1024))
    except Exception:
        return 32 * 1024 * 1024


def residual_block_down(x_nchw, params):
    """Forward pass.  x_nchw: (N, Cin, H, W) -> (N, Cout, H/2, W/2)."""
    w1, b1, w2, b2, wl, bl = params
    N, Cin, H, W = x_nchw.shape
    Cout = w1.shape[0]
    assert H % 2 == 0 and W % 2 == 0 and H >= 2 and W >= 2
    Hp, Wp = H + 2, W + 2
    Wh = W // 2
    L = (H - 1) * Wp + W
    HW4 = (H // 2) * Wh

    # Largest pooling group size <= 8 that divides H/2.
    half = H // 2
    G = 1
    for cand in range(min(8, half), 0, -1):
        if half % cand == 0:
            G = cand
            break
    S = (2 * G - 1) * Wp + W

    # Reflection-pad x on the XLA side (layout plumbing, read once by the kernel);
    # the raw-x centre tap for the residual conv is a static slice of it.
    xpad = jnp.pad(x_nchw.astype(jnp.float32),
                   ((0, 0), (0, 0), (1, 1), (1, 1)), mode="reflect")
    xpad_flat = xpad.reshape(N, Cin, Hp * Wp)

    # (out, in, 3, 3) -> (9, out, in), tap k = ky*3 + kx.
    w1_t = jnp.transpose(w1, (2, 3, 0, 1)).reshape(9, Cout, Cin).astype(jnp.float32)
    w2_t = jnp.transpose(w2, (2, 3, 0, 1)).reshape(9, Cout, Cout).astype(jnp.float32)
    wl_m = wl[:, :, 0, 0].astype(jnp.float32)                        # (Cout, Cin)
    b1_c = b1.reshape(Cout, 1).astype(jnp.float32)
    b2_c = b2.reshape(Cout, 1).astype(jnp.float32)
    bl_c = bl.reshape(Cout, 1).astype(jnp.float32)

    # Constant pooling matrix: maps a group's flat span (length S, strided-interior
    # layout with row stride Wp) to G*Wh pooled lanes.  Handles the 2x2 average and
    # zeros out junk lanes (j >= W).  Built once host-side (never per grid step).
    pool_np = np.zeros((S, G * Wh), np.float32)
    for p in range(S):
        r, j = divmod(p, Wp)
        if j < W:
            pool_np[p, (r // 2) * Wh + (j // 2)] = 0.25
    pool_mat = jnp.asarray(pool_np)

    kernel = functools.partial(_res_block_down_kernel, H=H, W=W, G=G)
    out_flat = pl.pallas_call(
        kernel,
        out_shape=jax.ShapeDtypeStruct((N, Cout, HW4), jnp.float32),
        grid=(N,),
        in_specs=[
            pl.BlockSpec((1, Cin, Hp * Wp), lambda n: (n, 0, 0)),   # padded x
            pl.BlockSpec((9, Cout, Cin), lambda n: (0, 0, 0)),      # conv1 taps
            pl.BlockSpec((Cout, 1), lambda n: (0, 0)),
            pl.BlockSpec((9, Cout, Cout), lambda n: (0, 0, 0)),     # conv2 taps
            pl.BlockSpec((Cout, 1), lambda n: (0, 0)),
            pl.BlockSpec((Cout, Cin), lambda n: (0, 0)),            # 1x1 residual
            pl.BlockSpec((Cout, 1), lambda n: (0, 0)),
            pl.BlockSpec((S, G * Wh), lambda n: (0, 0)),            # pool matrix
        ],
        out_specs=pl.BlockSpec((1, Cout, HW4), lambda n: (n, 0, 0)),
        scratch_shapes=[
            pltpu.VMEM((Cout, Hp * Wp), jnp.float32),   # padded relu(conv1)
            pltpu.VMEM((Cout, L), jnp.float32),         # conv1 accumulator
            pltpu.VMEM((Cout, L), jnp.float32),         # residual + conv2 accumulator
        ],
        compiler_params=pltpu.CompilerParams(
            dimension_semantics=("parallel",),          # N balances the v7x TCs
            vmem_limit_bytes=_vmem_limit_bytes(),
        ),
    )(xpad_flat, w1_t, b1_c, w2_t, b2_c, wl_m, bl_c, pool_mat)

    return out_flat.reshape(N, Cout, H // 2, Wh)


# ------------------------------ parameter glue ------------------------------- #

def spectral_normalize(w, key, n_iter=3, eps=1e-12):
    """nn.utils.spectral_norm semantics: weight / sigma, sigma via power iteration
    on weight.reshape(out_channels, -1) with a deterministic random u."""
    mat = w.reshape(w.shape[0], -1)
    u = jax.random.normal(key, (mat.shape[0],), dtype=jnp.float32)
    u = u / (jnp.linalg.norm(u) + eps)
    v = None
    for _ in range(n_iter):
        v = mat.T @ u
        v = v / (jnp.linalg.norm(v) + eps)
        u = mat @ v
        u = u / (jnp.linalg.norm(u) + eps)
    sigma = u @ (mat @ v)
    return w / sigma


# ------------------------------- reference ----------------------------------- #

def _reference(x_nchw, params):
    w1, b1, w2, b2, wl, bl = params

    def conv(x, w, b, pad):
        if pad > 0:
            x = jnp.pad(x, ((0, 0), (0, 0), (pad, pad), (pad, pad)), mode="reflect")
        y = lax.conv_general_dilated(x, w, (1, 1), "VALID",
                                     dimension_numbers=("NCHW", "OIHW", "NCHW"))
        return y + b.reshape(1, -1, 1, 1)

    def avgpool2(x):
        N, C, H, W = x.shape
        return x.reshape(N, C, H // 2, 2, W // 2, 2).mean(axis=(3, 5))

    out = jax.nn.relu(x_nchw)
    out = conv(out, w1, b1, 1)
    out = jax.nn.relu(out)
    out = conv(out, w2, b2, 1)
    out = avgpool2(out)
    res = conv(x_nchw, wl, bl, 0)
    res = avgpool2(res)
    return res + out


# ---------------------------------- main ------------------------------------- #

if __name__ == "__main__":
    N, Cin, Cout, H, W = 2, 4, 8, 16, 16
    key = jax.random.PRNGKey(0)
    keys = jax.random.split(key, 10)

    x_nchw = jax.random.normal(keys[0], (N, Cin, H, W), dtype=jnp.float32)

    # PyTorch Conv2d weight layout (out, in, kh, kw), spectral-normed conv weights.
    w_r1 = spectral_normalize(0.2 * jax.random.normal(keys[1], (Cout, Cin, 3, 3), jnp.float32), keys[7])
    b_r1 = 0.1 * jax.random.normal(keys[2], (Cout,), jnp.float32)
    w_r2 = spectral_normalize(0.2 * jax.random.normal(keys[3], (Cout, Cout, 3, 3), jnp.float32), keys[8])
    b_r2 = 0.1 * jax.random.normal(keys[4], (Cout,), jnp.float32)
    w_l = spectral_normalize(0.2 * jax.random.normal(keys[5], (Cout, Cin, 1, 1), jnp.float32), keys[9])
    b_l = 0.1 * jax.random.normal(keys[6], (Cout,), jnp.float32)

    params = (w_r1, b_r1, w_r2, b_r2, w_l, b_l)

    out = residual_block_down(x_nchw, params)
    out = jax.block_until_ready(out)
    assert out.shape == (N, Cout, H // 2, W // 2), out.shape

    ref = jax.block_until_ready(_reference(x_nchw, params))
    np.testing.assert_allclose(np.asarray(out), np.asarray(ref), rtol=1e-4, atol=1e-4)

    print("KERNEL_OK")
</pallas_src>

<mosaic_0001>
module attributes {stable_mosaic.version = 11 : i64} {
  func.func @_res_block_down_kernel(%arg0: i32, %arg1: memref<1x4x324xf32, #tpu.memory_space<vmem>>, %arg2: memref<9x8x4xf32, #tpu.memory_space<vmem>>, %arg3: memref<8x1xf32, #tpu.memory_space<vmem>>, %arg4: memref<9x8x8xf32, #tpu.memory_space<vmem>>, %arg5: memref<8x1xf32, #tpu.memory_space<vmem>>, %arg6: memref<8x4xf32, #tpu.memory_space<vmem>>, %arg7: memref<8x1xf32, #tpu.memory_space<vmem>>, %arg8: memref<286x64xf32, #tpu.memory_space<vmem>>, %arg9: memref<1x8x64xf32, #tpu.memory_space<vmem>>, %arg10: memref<8x324xf32, #tpu.memory_space<vmem>>, %arg11: memref<8x286xf32, #tpu.memory_space<vmem>>, %arg12: memref<8x286xf32, #tpu.memory_space<vmem>>) attributes {dimension_semantics = [#tpu.dimension_semantics<parallel>], iteration_bounds = array<i64: 2>, scalar_prefetch = 0 : i64, scratch_operands = 3 : i64, tpu.core_type = #tpu.core_type<tc>, window_params = [{transform_indices = @transform_0, window_bounds = array<i64: 1, 4, 324>}, {pipeline_mode = #tpu.pipeline_mode<synchronous>, transform_indices = @transform_1, window_bounds = array<i64: 9, 8, 4>}, {pipeline_mode = #tpu.pipeline_mode<synchronous>, transform_indices = @transform_2, window_bounds = array<i64: 8, 1>}, {pipeline_mode = #tpu.pipeline_mode<synchronous>, transform_indices = @transform_3, window_bounds = array<i64: 9, 8, 8>}, {pipeline_mode = #tpu.pipeline_mode<synchronous>, transform_indices = @transform_4, window_bounds = array<i64: 8, 1>}, {pipeline_mode = #tpu.pipeline_mode<synchronous>, transform_indices = @transform_5, window_bounds = array<i64: 8, 4>}, {pipeline_mode = #tpu.pipeline_mode<synchronous>, transform_indices = @transform_6, window_bounds = array<i64: 8, 1>}, {pipeline_mode = #tpu.pipeline_mode<synchronous>, transform_indices = @transform_7, window_bounds = array<i64: 286, 64>}, {transform_indices = @transform_8, window_bounds = array<i64: 1, 8, 64>}]} {
    %c0 = arith.constant 0 : index
    %c0_0 = arith.constant 0 : index
    %0 = vector.load %arg6[%c0, %c0_0] : memref<8x4xf32, #tpu.memory_space<vmem>>, vector<8x4xf32>
    %c0_1 = arith.constant 0 : index
    %c0_2 = arith.constant 0 : index
    %c19 = arith.constant 19 : index
    %1 = vector.load %arg1[%c0_1, %c0_2, %c19] : memref<1x4x324xf32, #tpu.memory_space<vmem>>, vector<1x4x286xf32>
    %2 = vector.shape_cast %1 : vector<1x4x286xf32> to vector<4x286xf32>
    %cst = arith.constant dense<0.000000e+00> : vector<8x286xf32>
    %3 = tpu.matmul %0, %2, %cst {dimension_numbers = #tpu.dot_dimension_numbers<[1], [0], [0], [1], [0, 0, 1, 1], [], []>} : vector<8x4xf32>, vector<4x286xf32>, vector<8x286xf32> -> vector<8x286xf32>
    %c0_3 = arith.constant 0 : index
    %c0_4 = arith.constant 0 : index
    %4 = vector.load %arg7[%c0_3, %c0_4] : memref<8x1xf32, #tpu.memory_space<vmem>>, vector<8x1xf32>
    %5 = vector.broadcast %4 : vector<8x1xf32> to vector<8x286xf32>
    %6 = arith.addf %3, %5 : vector<8x286xf32>
    %c0_5 = arith.constant 0 : index
    %c0_6 = arith.constant 0 : index
    %7 = vector.load %arg5[%c0_5, %c0_6] : memref<8x1xf32, #tpu.memory_space<vmem>>, vector<8x1xf32>
    %8 = vector.broadcast %7 : vector<8x1xf32> to vector<8x286xf32>
    %9 = arith.addf %6, %8 : vector<8x286xf32>
    %c0_7 = arith.constant 0 : index
    %c0_8 = arith.constant 0 : index
    %10 = vector.load %arg12[%c0_7, %c0_8] : memref<8x286xf32, #tpu.memory_space<vmem>>, vector<8x286xf32>
    tpu.vector_store %arg12[%c0_7, %c0_8], %9 {strides = array<i32>} : memref<8x286xf32, #tpu.memory_space<vmem>>, vector<8x286xf32>,
    %c0_9 = arith.constant 0 : index
    %c0_10 = arith.constant 0 : index
    %c0_11 = arith.constant 0 : index
    %11 = vector.load %arg1[%c0_9, %c0_10, %c0_11] : memref<1x4x324xf32, #tpu.memory_space<vmem>>, vector<1x4x324xf32>
    %12 = vector.shape_cast %11 : vector<1x4x324xf32> to vector<4x324xf32>
    %cst_12 = arith.constant 0.000000e+00 : f32
    %13 = vector.broadcast %cst_12 : f32 to vector<4x324xf32>
    %14 = arith.maximumf %12, %13 : vector<4x324xf32>
    %c0_13 = arith.constant 0 : index
    %c0_14 = arith.constant 0 : index
    %c0_15 = arith.constant 0 : index
    %15 = vector.load %arg1[%c0_13, %c0_14, %c0_15] : memref<1x4x324xf32, #tpu.memory_space<vmem>>, vector<1x4x324xf32>
    %16 = vector.shape_cast %15 : vector<1x4x324xf32> to vector<4x324xf32>
    %17 = vector.shape_cast %14 : vector<4x324xf32> to vector<1x4x324xf32>
    tpu.vector_store %arg1[%c0_13, %c0_14, %c0_15], %17 {strides = array<i32>} : memref<1x4x324xf32, #tpu.memory_space<vmem>>, vector<1x4x324xf32>,
    %c0_16 = arith.constant 0 : index
    %c0_17 = arith.constant 0 : index
    %c0_18 = arith.constant 0 : index
    %18 = vector.load %arg2[%c0_16, %c0_17, %c0_18] : memref<9x8x4xf32, #tpu.memory_space<vmem>>, vector<1x8x4xf32>
    %19 = vector.shape_cast %18 : vector<1x8x4xf32> to vector<8x4xf32>
    %c0_19 = arith.constant 0 : index
    %c0_20 = arith.constant 0 : index
    %c0_21 = arith.constant 0 : index
    %20 = vector.load %arg1[%c0_19, %c0_20, %c0_21] : memref<1x4x324xf32, #tpu.memory_space<vmem>>, vector<1x4x286xf32>
    %21 = vector.shape_cast %20 : vector<1x4x286xf32> to vector<4x286xf32>
    %cst_22 = arith.constant dense<0.000000e+00> : vector<8x286xf32>
    %22 = tpu.matmul %19, %21, %cst_22 {dimension_numbers = #tpu.dot_dimension_numbers<[1], [0], [0], [1], [0, 0, 1, 1], [], []>} : vector<8x4xf32>, vector<4x286xf32>, vector<8x286xf32> -> vector<8x286xf32>
    %c0_23 = arith.constant 0 : index
    %c0_24 = arith.constant 0 : index
    %23 = vector.load %arg3[%c0_23, %c0_24] : memref<8x1xf32, #tpu.memory_space<vmem>>, vector<8x1xf32>
    %24 = vector.broadcast %23 : vector<8x1xf32> to vector<8x286xf32>
    %25 = arith.addf %22, %24 : vector<8x286xf32>
    %c0_25 = arith.constant 0 : index
    %c0_26 = arith.constant 0 : index
    %26 = vector.load %arg11[%c0_25, %c0_26] : memref<8x286xf32, #tpu.memory_space<vmem>>, vector<8x286xf32>
    tpu.vector_store %arg11[%c0_25, %c0_26], %25 {strides = array<i32>} : memref<8x286xf32, #tpu.memory_space<vmem>>, vector<8x286xf32>,
    %c0_27 = arith.constant 0 : index
    %c0_28 = arith.constant 0 : index
    %27 = vector.load %arg11[%c0_27, %c0_28] : memref<8x286xf32, #tpu.memory_space<vmem>>, vector<8x286xf32>
    %c1 = arith.constant 1 : index
    %c0_29 = arith.constant 0 : index
    %c0_30 = arith.constant 0 : index
    %28 = vector.load %arg2[%c1, %c0_29, %c0_30] : memref<9x8x4xf32, #tpu.memory_space<vmem>>, vector<1x8x4xf32>
    %29 = vector.shape_cast %28 : vector<1x8x4xf32> to vector<8x4xf32>
    %c0_31 = arith.constant 0 : index
    %c0_32 = arith.constant 0 : index
    %c1_33 = arith.constant 1 : index
    %30 = vector.load %arg1[%c0_31, %c0_32, %c1_33] : memref<1x4x324xf32, #tpu.memory_space<vmem>>, vector<1x4x286xf32>
    %31 = vector.shape_cast %30 : vector<1x4x286xf32> to vector<4x286xf32>
    %cst_34 = arith.constant dense<0.000000e+00> : vector<8x286xf32>
    %32 = tpu.matmul %29, %31, %cst_34 {dimension_numbers = #tpu.dot_dimension_numbers<[1], [0], [0], [1], [0, 0, 1, 1], [], []>} : vector<8x4xf32>, vector<4x286xf32>, vector<8x286xf32> -> vector<8x286xf32>
    %33 = arith.addf %27, %32 : vector<8x286xf32>
    %c0_35 = arith.constant 0 : index
    %c0_36 = arith.constant 0 : index
    %34 = vector.load %arg11[%c0_35, %c0_36] : memref<8x286xf32, #tpu.memory_space<vmem>>, vector<8x286xf32>
    tpu.vector_store %arg11[%c0_35, %c0_36], %33 {strides = array<i32>} : memref<8x286xf32, #tpu.memory_space<vmem>>, vector<8x286xf32>,
    %c0_37 = arith.constant 0 : index
    %c0_38 = arith.constant 0 : index
    %35 = vector.load %arg11[%c0_37, %c0_38] : memref<8x286xf32, #tpu.memory_space<vmem>>, vector<8x286xf32>
    %c2 = arith.constant 2 : index
    %c0_39 = arith.constant 0 : index
    %c0_40 = arith.constant 0 : index
    %36 = vector.load %arg2[%c2, %c0_39, %c0_40] : memref<9x8x4xf32, #tpu.memory_space<vmem>>, vector<1x8x4xf32>
    %37 = vector.shape_cast %36 : vector<1x8x4xf32> to vector<8x4xf32>
    %c0_41 = arith.constant 0 : index
    %c0_42 = arith.constant 0 : index
    %c2_43 = arith.constant 2 : index
    %38 = vector.load %arg1[%c0_41, %c0_42, %c2_43] : memref<1x4x324xf32, #tpu.memory_space<vmem>>, vector<1x4x286xf32>
    %39 = vector.shape_cast %38 : vector<1x4x286xf32> to vector<4x286xf32>
    %cst_44 = arith.constant dense<0.000000e+00> : vector<8x286xf32>
    %40 = tpu.matmul %37, %39, %cst_44 {dimension_numbers = #tpu.dot_dimension_numbers<[1], [0], [0], [1], [0, 0, 1, 1], [], []>} : vector<8x4xf32>, vector<4x286xf32>, vector<8x286xf32> -> vector<8x286xf32>
    %41 = arith.addf %35, %40 : vector<8x286xf32>
    %c0_45 = arith.constant 0 : index
    %c0_46 = arith.constant 0 : index
    %42 = vector.load %arg11[%c0_45, %c0_46] : memref<8x286xf32, #tpu.memory_space<vmem>>, vector<8x286xf32>
    tpu.vector_store %arg11[%c0_45, %c0_46], %41 {strides = array<i32>} : memref<8x286xf32, #tpu.memory_space<vmem>>, vector<8x286xf32>,
    %c0_47 = arith.constant 0 : index
    %c0_48 = arith.constant 0 : index
    %43 = vector.load %arg11[%c0_47, %c0_48] : memref<8x286xf32, #tpu.memory_space<vmem>>, vector<8x286xf32>
    %c3 = arith.constant 3 : index
    %c0_49 = arith.constant 0 : index
    %c0_50 = arith.constant 0 : index
    %44 = vector.load %arg2[%c3, %c0_49, %c0_50] : memref<9x8x4xf32, #tpu.memory_space<vmem>>, vector<1x8x4xf32>
    %45 = vector.shape_cast %44 : vector<1x8x4xf32> to vector<8x4xf32>
    %c0_51 = arith.constant 0 : index
    %c0_52 = arith.constant 0 : index
    %c18 = arith.constant 18 : index
    %46 = vector.load %arg1[%c0_51, %c0_52, %c18] : memref<1x4x324xf32, #tpu.memory_space<vmem>>, vector<1x4x286xf32>
    %47 = vector.shape_cast %46 : vector<1x4x286xf32> to vector<4x286xf32>
    %cst_53 = arith.constant dense<0.000000e+00> : vector<8x286xf32>
    %48 = tpu.matmul %45, %47, %cst_53 {dimension_numbers = #tpu.dot_dimension_numbers<[1], [0], [0], [1], [0, 0, 1, 1], [], []>} : vector<8x4xf32>, vector<4x286xf32>, vector<8x286xf32> -> vector<8x286xf32>
    %49 = arith.addf %43, %48 : vector<8x286xf32>
    %c0_54 = arith.constant 0 : index
    %c0_55 = arith.constant 0 : index
    %50 = vector.load %arg11[%c0_54, %c0_55] : memref<8x286xf32, #tpu.memory_space<vmem>>, vector<8x286xf32>
    tpu.vector_store %arg11[%c0_54, %c0_55], %49 {strides = array<i32>} : memref<8x286xf32, #tpu.memory_space<vmem>>, vector<8x286xf32>,
    %c0_56 = arith.constant 0 : index
    %c0_57 = arith.constant 0 : index
    %51 = vector.load %arg11[%c0_56, %c0_57] : memref<8x286xf32, #tpu.memory_space<vmem>>, vector<8x286xf32>
    %c4 = arith.constant 4 : index
    %c0_58 = arith.constant 0 : index
    %c0_59 = arith.constant 0 : index
    %52 = vector.load %arg2[%c4, %c0_58, %c0_59] : memref<9x8x4xf32, #tpu.memory_space<vmem>>, vector<1x8x4xf32>
    %53 = vector.shape_cast %52 : vector<1x8x4xf32> to vector<8x4xf32>
    %c0_60 = arith.constant 0 : index
    %c0_61 = arith.constant 0 : index
    %c19_62 = arith.constant 19 : index
    %54 = vector.load %arg1[%c0_60, %c0_61, %c19_62] : memref<1x4x324xf32, #tpu.memory_space<vmem>>, vector<1x4x286xf32>
    %55 = vector.shape_cast %54 : vector<1x4x286xf32> to vector<4x286xf32>
    %cst_63 = arith.constant dense<0.000000e+00> : vector<8x286xf32>
    %56 = tpu.matmul %53, %55, %cst_63 {dimension_numbers = #tpu.dot_dimension_numbers<[1], [0], [0], [1], [0, 0, 1, 1], [], []>} : vector<8x4xf32>, vector<4x286xf32>, vector<8x286xf32> -> vector<8x286xf32>
    %57 = arith.addf %51, %56 : vector<8x286xf32>
    %c0_64 = arith.constant 0 : index
    %c0_65 = arith.constant 0 : index
    %58 = vector.load %arg11[%c0_64, %c0_65] : memref<8x286xf32, #tpu.memory_space<vmem>>, vector<8x286xf32>
    tpu.vector_store %arg11[%c0_64, %c0_65], %57 {strides = array<i32>} : memref<8x286xf32, #tpu.memory_space<vmem>>, vector<8x286xf32>,
    %c0_66 = arith.constant 0 : index
    %c0_67 = arith.constant 0 : index
    %59 = vector.load %arg11[%c0_66, %c0_67] : memref<8x286xf32, #tpu.memory_space<vmem>>, vector<8x286xf32>
    %c5 = arith.constant 5 : index
    %c0_68 = arith.constant 0 : index
    %c0_69 = arith.constant 0 : index
    %60 = vector.load %arg2[%c5, %c0_68, %c0_69] : memref<9x8x4xf32, #tpu.memory_space<vmem>>, vector<1x8x4xf32>
    %61 = vector.shape_cast %60 : vector<1x8x4xf32> to vector<8x4xf32>
    %c0_70 = arith.constant 0 : index
    %c0_71 = arith.constant 0 : index
    %c20 = arith.constant 20 : index
    %62 = vector.load %arg1[%c0_70, %c0_71, %c20] : memref<1x4x324xf32, #tpu.memory_space<vmem>>, vector<1x4x286xf32>
    %63 = vector.shape_cast %62 : vector<1x4x286xf32> to vector<4x286xf32>
    %cst_72 = arith.constant dense<0.000000e+00> : vector<8x286xf32>
    %64 = tpu.matmul %61, %63, %cst_72 {dimension_numbers = #tpu.dot_dimension_numbers<[1], [0], [0], [1], [0, 0, 1, 1], [], []>} : vector<8x4xf32>, vector<4x286xf32>, vector<8x286xf32> -> vector<8x286xf32>
    %65 = arith.addf %59, %64 : vector<8x286xf32>
    %c0_73 = arith.constant 0 : index
    %c0_74 = arith.constant 0 : index
    %66 = vector.load %arg11[%c0_73, %c0_74] : memref<8x286xf32, #tpu.memory_space<vmem>>, vector<8x286xf32>
    tpu.vector_store %arg11[%c0_73, %c0_74], %65 {strides = array<i32>} : memref<8x286xf32, #tpu.memory_space<vmem>>, vector<8x286xf32>,
    %c0_75 = arith.constant 0 : index
    %c0_76 = arith.constant 0 : index
    %67 = vector.load %arg11[%c0_75, %c0_76] : memref<8x286xf32, #tpu.memory_space<vmem>>, vector<8x286xf32>
    %c6 = arith.constant 6 : index
    %c0_77 = arith.constant 0 : index
    %c0_78 = arith.constant 0 : index
    %68 = vector.load %arg2[%c6, %c0_77, %c0_78] : memref<9x8x4xf32, #tpu.memory_space<vmem>>, vector<1x8x4xf32>
    %69 = vector.shape_cast %68 : vector<1x8x4xf32> to vector<8x4xf32>
    %c0_79 = arith.constant 0 : index
    %c0_80 = arith.constant 0 : index
    %c36 = arith.constant 36 : index
    %70 = vector.load %arg1[%c0_79, %c0_80, %c36] : memref<1x4x324xf32, #tpu.memory_space<vmem>>, vector<1x4x286xf32>
    %71 = vector.shape_cast %70 : vector<1x4x286xf32> to vector<4x286xf32>
    %cst_81 = arith.constant dense<0.000000e+00> : vector<8x286xf32>
    %72 = tpu.matmul %69, %71, %cst_81 {dimension_numbers = #tpu.dot_dimension_numbers<[1], [0], [0], [1], [0, 0, 1, 1], [], []>} : vector<8x4xf32>, vector<4x286xf32>, vector<8x286xf32> -> vector<8x286xf32>
    %73 = arith.addf %67, %72 : vector<8x286xf32>
    %c0_82 = arith.constant 0 : index
    %c0_83 = arith.constant 0 : index
    %74 = vector.load %arg11[%c0_82, %c0_83] : memref<8x286xf32, #tpu.memory_space<vmem>>, vector<8x286xf32>
    tpu.vector_store %arg11[%c0_82, %c0_83], %73 {strides = array<i32>} : memref<8x286xf32, #tpu.memory_space<vmem>>, vector<8x286xf32>,
    %c0_84 = arith.constant 0 : index
    %c0_85 = arith.constant 0 : index
    %75 = vector.load %arg11[%c0_84, %c0_85] : memref<8x286xf32, #tpu.memory_space<vmem>>, vector<8x286xf32>
    %c7 = arith.constant 7 : index
    %c0_86 = arith.constant 0 : index
    %c0_87 = arith.constant 0 : index
    %76 = vector.load %arg2[%c7, %c0_86, %c0_87] : memref<9x8x4xf32, #tpu.memory_space<vmem>>, vector<1x8x4xf32>
    %77 = vector.shape_cast %76 : vector<1x8x4xf32> to vector<8x4xf32>
    %c0_88 = arith.constant 0 : index
    %c0_89 = arith.constant 0 : index
    %c37 = arith.constant 37 : index
    %78 = vector.load %arg1[%c0_88, %c0_89, %c37] : memref<1x4x324xf32, #tpu.memory_space<vmem>>, vector<1x4x286xf32>
    %79 = vector.shape_cast %78 : vector<1x4x286xf32> to vector<4x286xf32>
    %cst_90 = arith.constant dense<0.000000e+00> : vector<8x286xf32>
    %80 = tpu.matmul %77, %79, %cst_90 {dimension_numbers = #tpu.dot_dimension_numbers<[1], [0], [0], [1], [0, 0, 1, 1], [], []>} : vector<8x4xf32>, vector<4x286xf32>, vector<8x286xf32> -> vector<8x286xf32>
    %81 = arith.addf %75, %80 : vector<8x286xf32>
    %c0_91 = arith.constant 0 : index
    %c0_92 = arith.constant 0 : index
    %82 = vector.load %arg11[%c0_91, %c0_92] : memref<8x286xf32, #tpu.memory_space<vmem>>, vector<8x286xf32>
    tpu.vector_store %arg11[%c0_91, %c0_92], %81 {strides = array<i32>} : memref<8x286xf32, #tpu.memory_space<vmem>>, vector<8x286xf32>,
    %c0_93 = arith.constant 0 : index
    %c0_94 = arith.constant 0 : index
    %83 = vector.load %arg11[%c0_93, %c0_94] : memref<8x286xf32, #tpu.memory_space<vmem>>, vector<8x286xf32>
    %c8 = arith.constant 8 : index
    %c0_95 = arith.constant 0 : index
    %c0_96 = arith.constant 0 : index
    %84 = vector.load %arg2[%c8, %c0_95, %c0_96] : memref<9x8x4xf32, #tpu.memory_space<vmem>>, vector<1x8x4xf32>
    %85 = vector.shape_cast %84 : vector<1x8x4xf32> to vector<8x4xf32>
    %c0_97 = arith.constant 0 : index
    %c0_98 = arith.constant 0 : index
    %c38 = arith.constant 38 : index
    %86 = vector.load %arg1[%c0_97, %c0_98, %c38] : memref<1x4x324xf32, #tpu.memory_space<vmem>>, vector<1x4x286xf32>
    %87 = vector.shape_cast %86 : vector<1x4x286xf32> to vector<4x286xf32>
    %cst_99 = arith.constant dense<0.000000e+00> : vector<8x286xf32>
    %88 = tpu.matmul %85, %87, %cst_99 {dimension_numbers = #tpu.dot_dimension_numbers<[1], [0], [0], [1], [0, 0, 1, 1], [], []>} : vector<8x4xf32>, vector<4x286xf32>, vector<8x286xf32> -> vector<8x286xf32>
    %89 = arith.addf %83, %88 : vector<8x286xf32>
    %c0_100 = arith.constant 0 : index
    %c0_101 = arith.constant 0 : index
    %90 = vector.load %arg11[%c0_100, %c0_101] : memref<8x286xf32, #tpu.memory_space<vmem>>, vector<8x286xf32>
    tpu.vector_store %arg11[%c0_100, %c0_101], %89 {strides = array<i32>} : memref<8x286xf32, #tpu.memory_space<vmem>>, vector<8x286xf32>,
    %c0_102 = arith.constant 0 : index
    %c0_103 = arith.constant 0 : index
    %91 = vector.load %arg11[%c0_102, %c0_103] : memref<8x286xf32, #tpu.memory_space<vmem>>, vector<8x286xf32>
    %cst_104 = arith.constant 0.000000e+00 : f32
    %92 = vector.broadcast %cst_104 : f32 to vector<8x286xf32>
    %93 = arith.maximumf %91, %92 : vector<8x286xf32>
    %c0_105 = arith.constant 0 : index
    %c19_106 = arith.constant 19 : index
    %94 = vector.load %arg10[%c0_105, %c19_106] : memref<8x324xf32, #tpu.memory_space<vmem>>, vector<8x286xf32>
    tpu.vector_store %arg10[%c0_105, %c19_106], %93 {strides = array<i32>} : memref<8x324xf32, #tpu.memory_space<vmem>>, vector<8x286xf32>,
    %c0_107 = arith.constant 0 : index
    %c37_108 = arith.constant 37 : index
    %95 = vector.load %arg10[%c0_107, %c37_108] : memref<8x324xf32, #tpu.memory_space<vmem>>, vector<8x16xf32>
    %c0_109 = arith.constant 0 : index
    %c1_110 = arith.constant 1 : index
    %96 = vector.load %arg10[%c0_109, %c1_110] : memref<8x324xf32, #tpu.memory_space<vmem>>, vector<8x16xf32>
    tpu.vector_store %arg10[%c0_109, %c1_110], %95 {strides = array<i32>} : memref<8x324xf32, #tpu.memory_space<vmem>>, vector<8x16xf32>,
    %c0_111 = arith.constant 0 : index
    %c271 = arith.constant 271 : index
    %97 = vector.load %arg10[%c0_111, %c271] : memref<8x324xf32, #tpu.memory_space<vmem>>, vector<8x16xf32>
    %c0_112 = arith.constant 0 : index
    %c307 = arith.constant 307 : index
    %98 = vector.load %arg10[%c0_112, %c307] : memref<8x324xf32, #tpu.memory_space<vmem>>, vector<8x16xf32>
    tpu.vector_store %arg10[%c0_112, %c307], %97 {strides = array<i32>} : memref<8x324xf32, #tpu.memory_space<vmem>>, vector<8x16xf32>,
    %c0_113 = arith.constant 0 : index
    %c2_114 = arith.constant 2 : index
    %99 = vector.load %arg10[%c0_113, %c2_114] : memref<8x324xf32, #tpu.memory_space<vmem>>, vector<8x1xf32>
    %c0_115 = arith.constant 0 : index
    %c0_116 = arith.constant 0 : index
    %100 = vector.load %arg10[%c0_115, %c0_116] : memref<8x324xf32, #tpu.memory_space<vmem>>, vector<8x1xf32>
    tpu.vector_store %arg10[%c0_115, %c0_116], %99 {strides = array<i32>} : memref<8x324xf32, #tpu.memory_space<vmem>>, vector<8x1xf32>,
    %c0_117 = arith.constant 0 : index
    %c15 = arith.constant 15 : index
    %101 = vector.load %arg10[%c0_117, %c15] : memref<8x324xf32, #tpu.memory_space<vmem>>, vector<8x1xf32>
    %c0_118 = arith.constant 0 : index
    %c17 = arith.constant 17 : index
    %102 = vector.load %arg10[%c0_118, %c17] : memref<8x324xf32, #tpu.memory_space<vmem>>, vector<8x1xf32>
    tpu.vector_store %arg10[%c0_118, %c17], %101 {strides = array<i32>} : memref<8x324xf32, #tpu.memory_space<vmem>>, vector<8x1xf32>,
    %c0_119 = arith.constant 0 : index
    %c20_120 = arith.constant 20 : index
    %103 = vector.load %arg10[%c0_119, %c20_120] : memref<8x324xf32, #tpu.memory_space<vmem>>, vector<8x1xf32>
    %c0_121 = arith.constant 0 : index
    %c18_122 = arith.constant 18 : index
    %104 = vector.load %arg10[%c0_121, %c18_122] : memref<8x324xf32, #tpu.memory_space<vmem>>, vector<8x1xf32>
    tpu.vector_store %arg10[%c0_121, %c18_122], %103 {strides = array<i32>} : memref<8x324xf32, #tpu.memory_space<vmem>>, vector<8x1xf32>,
    %c0_123 = arith.constant 0 : index
    %c33 = arith.constant 33 : index
    %105 = vector.load %arg10[%c0_123, %c33] : memref<8x324xf32, #tpu.memory_space<vmem>>, vector<8x1xf32>
    %c0_124 = arith.constant 0 : index
    %c35 = arith.constant 35 : index
    %106 = vector.load %arg10[%c0_124, %c35] : memref<8x324xf32, #tpu.memory_space<vmem>>, vector<8x1xf32>
    tpu.vector_store %arg10[%c0_124, %c35], %105 {strides = array<i32>} : memref<8x324xf32, #tpu.memory_space<vmem>>, vector<8x1xf32>,
    %c0_125 = arith.constant 0 : index
    %c38_126 = arith.constant 38 : index
    %107 = vector.load %arg10[%c0_125, %c38_126] : memref<8x324xf32, #tpu.memory_space<vmem>>, vector<8x1xf32>
    %c0_127 = arith.constant 0 : index
    %c36_128 = arith.constant 36 : index
    %108 = vector.load %arg10[%c0_127, %c36_128] : memref<8x324xf32, #tpu.memory_space<vmem>>, vector<8x1xf32>
    tpu.vector_store %arg10[%c0_127, %c36_128], %107 {strides = array<i32>} : memref<8x324xf32, #tpu.memory_space<vmem>>, vector<8x1xf32>,
    %c0_129 = arith.constant 0 : index
    %c51 = arith.constant 51 : index
    %109 = vector.load %arg10[%c0_129, %c51] : memref<8x324xf32, #tpu.memory_space<vmem>>, vector<8x1xf32>
    %c0_130 = arith.constant 0 : index
    %c53 = arith.constant 53 : index
    %110 = vector.load %arg10[%c0_130, %c53] : memref<8x324xf32, #tpu.memory_space<vmem>>, vector<8x1xf32>
    tpu.vector_store %arg10[%c0_130, %c53], %109 {strides = array<i32>} : memref<8x324xf32, #tpu.memory_space<vmem>>, vector<8x1xf32>,
    %c0_131 = arith.constant 0 : index
    %c56 = arith.constant 56 : index
    %111 = vector.load %arg10[%c0_131, %c56] : memref<8x324xf32, #tpu.memory_space<vmem>>, vector<8x1xf32>
    %c0_132 = arith.constant 0 : index
    %c54 = arith.constant 54 : index
    %112 = vector.load %arg10[%c0_132, %c54] : memref<8x324xf32, #tpu.memory_space<vmem>>, vector<8x1xf32>
    tpu.vector_store %arg10[%c0_132, %c54], %111 {strides = array<i32>} : memref<8x324xf32, #tpu.memory_space<vmem>>, vector<8x1xf32>,
    %c0_133 = arith.constant 0 : index
    %c69 = arith.constant 69 : index
    %113 = vector.load %arg10[%c0_133, %c69] : memref<8x324xf32, #tpu.memory_space<vmem>>, vector<8x1xf32>
    %c0_134 = arith.constant 0 : index
    %c71 = arith.constant 71 : index
    %114 = vector.load %arg10[%c0_134, %c71] : memref<8x324xf32, #tpu.memory_space<vmem>>, vector<8x1xf32>
    tpu.vector_store %arg10[%c0_134, %c71], %113 {strides = array<i32>} : memref<8x324xf32, #tpu.memory_space<vmem>>, vector<8x1xf32>,
    %c0_135 = arith.constant 0 : index
    %c74 = arith.constant 74 : index
    %115 = vector.load %arg10[%c0_135, %c74] : memref<8x324xf32, #tpu.memory_space<vmem>>, vector<8x1xf32>
    %c0_136 = arith.constant 0 : index
    %c72 = arith.constant 72 : index
    %116 = vector.load %arg10[%c0_136, %c72] : memref<8x324xf32, #tpu.memory_space<vmem>>, vector<8x1xf32>
    tpu.vector_store %arg10[%c0_136, %c72], %115 {strides = array<i32>} : memref<8x324xf32, #tpu.memory_space<vmem>>, vector<8x1xf32>,
    %c0_137 = arith.constant 0 : index
    %c87 = arith.constant 87 : index
    %117 = vector.load %arg10[%c0_137, %c87] : memref<8x324xf32, #tpu.memory_space<vmem>>, vector<8x1xf32>
    %c0_138 = arith.constant 0 : index
    %c89 = arith.constant 89 : index
    %118 = vector.load %arg10[%c0_138, %c89] : memref<8x324xf32, #tpu.memory_space<vmem>>, vector<8x1xf32>
    tpu.vector_store %arg10[%c0_138, %c89], %117 {strides = array<i32>} : memref<8x324xf32, #tpu.memory_space<vmem>>, vector<8x1xf32>,
    %c0_139 = arith.constant 0 : index
    %c92 = arith.constant 92 : index
    %119 = vector.load %arg10[%c0_139, %c92] : memref<8x324xf32, #tpu.memory_space<vmem>>, vector<8x1xf32>
    %c0_140 = arith.constant 0 : index
    %c90 = arith.constant 90 : index
    %120 = vector.load %arg10[%c0_140, %c90] : memref<8x324xf32, #tpu.memory_space<vmem>>, vector<8x1xf32>
    tpu.vector_store %arg10[%c0_140, %c90], %119 {strides = array<i32>} : memref<8x324xf32, #tpu.memory_space<vmem>>, vector<8x1xf32>,
    %c0_141 = arith.constant 0 : index
    %c105 = arith.constant 105 : index
    %121 = vector.load %arg10[%c0_141, %c105] : memref<8x324xf32, #tpu.memory_space<vmem>>, vector<8x1xf32>
    %c0_142 = arith.constant 0 : index
    %c107 = arith.constant 107 : index
    %122 = vector.load %arg10[%c0_142, %c107] : memref<8x324xf32, #tpu.memory_space<vmem>>, vector<8x1xf32>
    tpu.vector_store %arg10[%c0_142, %c107], %121 {strides = array<i32>} : memref<8x324xf32, #tpu.memory_space<vmem>>, vector<8x1xf32>,
    %c0_143 = arith.constant 0 : index
    %c110 = arith.constant 110 : index
    %123 = vector.load %arg10[%c0_143, %c110] : memref<8x324xf32, #tpu.memory_space<vmem>>, vector<8x1xf32>
    %c0_144 = arith.constant 0 : index
    %c108 = arith.constant 108 : index
    %124 = vector.load %arg10[%c0_144, %c108] : memref<8x324xf32, #tpu.memory_space<vmem>>, vector<8x1xf32>
    tpu.vector_store %arg10[%c0_144, %c108], %123 {strides = array<i32>} : memref<8x324xf32, #tpu.memory_space<vmem>>, vector<8x1xf32>,
    %c0_145 = arith.constant 0 : index
    %c123 = arith.constant 123 : index
    %125 = vector.load %arg10[%c0_145, %c123] : memref<8x324xf32, #tpu.memory_space<vmem>>, vector<8x1xf32>
    %c0_146 = arith.constant 0 : index
    %c125 = arith.constant 125 : index
    %126 = vector.load %arg10[%c0_146, %c125] : memref<8x324xf32, #tpu.memory_space<vmem>>, vector<8x1xf32>
    tpu.vector_store %arg10[%c0_146, %c125], %125 {strides = array<i32>} : memref<8x324xf32, #tpu.memory_space<vmem>>, vector<8x1xf32>,
    %c0_147 = arith.constant 0 : index
    %c128 = arith.constant 128 : index
    %127 = vector.load %arg10[%c0_147, %c128] : memref<8x324xf32, #tpu.memory_space<vmem>>, vector<8x1xf32>
    %c0_148 = arith.constant 0 : index
    %c126 = arith.constant 126 : index
    %128 = vector.load %arg10[%c0_148, %c126] : memref<8x324xf32, #tpu.memory_space<vmem>>, vector<8x1xf32>
    tpu.vector_store %arg10[%c0_148, %c126], %127 {strides = array<i32>} : memref<8x324xf32, #tpu.memory_space<vmem>>, vector<8x1xf32>,
    %c0_149 = arith.constant 0 : index
    %c141 = arith.constant 141 : index
    %129 = vector.load %arg10[%c0_149, %c141] : memref<8x324xf32, #tpu.memory_space<vmem>>, vector<8x1xf32>
    %c0_150 = arith.constant 0 : index
    %c143 = arith.constant 143 : index
    %130 = vector.load %arg10[%c0_150, %c143] : memref<8x324xf32, #tpu.memory_space<vmem>>, vector<8x1xf32>
    tpu.vector_store %arg10[%c0_150, %c143], %129 {strides = array<i32>} : memref<8x324xf32, #tpu.memory_space<vmem>>, vector<8x1xf32>,
    %c0_151 = arith.constant 0 : index
    %c146 = arith.constant 146 : index
    %131 = vector.load %arg10[%c0_151, %c146] : memref<8x324xf32, #tpu.memory_space<vmem>>, vector<8x1xf32>
    %c0_152 = arith.constant 0 : index
    %c144 = arith.constant 144 : index
    %132 = vector.load %arg10[%c0_152, %c144] : memref<8x324xf32, #tpu.memory_space<vmem>>, vector<8x1xf32>
    tpu.vector_store %arg10[%c0_152, %c144], %131 {strides = array<i32>} : memref<8x324xf32, #tpu.memory_space<vmem>>, vector<8x1xf32>,
    %c0_153 = arith.constant 0 : index
    %c159 = arith.constant 159 : index
    %133 = vector.load %arg10[%c0_153, %c159] : memref<8x324xf32, #tpu.memory_space<vmem>>, vector<8x1xf32>
    %c0_154 = arith.constant 0 : index
    %c161 = arith.constant 161 : index
    %134 = vector.load %arg10[%c0_154, %c161] : memref<8x324xf32, #tpu.memory_space<vmem>>, vector<8x1xf32>
    tpu.vector_store %arg10[%c0_154, %c161], %133 {strides = array<i32>} : memref<8x324xf32, #tpu.memory_space<vmem>>, vector<8x1xf32>,
    %c0_155 = arith.constant 0 : index
    %c164 = arith.constant 164 : index
    %135 = vector.load %arg10[%c0_155, %c164] : memref<8x324xf32, #tpu.memory_space<vmem>>, vector<8x1xf32>
    %c0_156 = arith.constant 0 : index
    %c162 = arith.constant 162 : index
    %136 = vector.load %arg10[%c0_156, %c162] : memref<8x324xf32, #tpu.memory_space<vmem>>, vector<8x1xf32>
    tpu.vector_store %arg10[%c0_156, %c162], %135 {strides = array<i32>} : memref<8x324xf32, #tpu.memory_space<vmem>>, vector<8x1xf32>,
    %c0_157 = arith.constant 0 : index
    %c177 = arith.constant 177 : index
    %137 = vector.load %arg10[%c0_157, %c177] : memref<8x324xf32, #tpu.memory_space<vmem>>, vector<8x1xf32>
    %c0_158 = arith.constant 0 : index
    %c179 = arith.constant 179 : index
    %138 = vector.load %arg10[%c0_158, %c179] : memref<8x324xf32, #tpu.memory_space<vmem>>, vector<8x1xf32>
    tpu.vector_store %arg10[%c0_158, %c179], %137 {strides = array<i32>} : memref<8x324xf32, #tpu.memory_space<vmem>>, vector<8x1xf32>,
    %c0_159 = arith.constant 0 : index
    %c182 = arith.constant 182 : index
    %139 = vector.load %arg10[%c0_159, %c182] : memref<8x324xf32, #tpu.memory_space<vmem>>, vector<8x1xf32>
    %c0_160 = arith.constant 0 : index
    %c180 = arith.constant 180 : index
    %140 = vector.load %arg10[%c0_160, %c180] : memref<8x324xf32, #tpu.memory_space<vmem>>, vector<8x1xf32>
    tpu.vector_store %arg10[%c0_160, %c180], %139 {strides = array<i32>} : memref<8x324xf32, #tpu.memory_space<vmem>>, vector<8x1xf32>,
    %c0_161 = arith.constant 0 : index
    %c195 = arith.constant 195 : index
    %141 = vector.load %arg10[%c0_161, %c195] : memref<8x324xf32, #tpu.memory_space<vmem>>, vector<8x1xf32>
    %c0_162 = arith.constant 0 : index
    %c197 = arith.constant 197 : index
    %142 = vector.load %arg10[%c0_162, %c197] : memref<8x324xf32, #tpu.memory_space<vmem>>, vector<8x1xf32>
    tpu.vector_store %arg10[%c0_162, %c197], %141 {strides = array<i32>} : memref<8x324xf32, #tpu.memory_space<vmem>>, vector<8x1xf32>,
    %c0_163 = arith.constant 0 : index
    %c200 = arith.constant 200 : index
    %143 = vector.load %arg10[%c0_163, %c200] : memref<8x324xf32, #tpu.memory_space<vmem>>, vector<8x1xf32>
    %c0_164 = arith.constant 0 : index
    %c198 = arith.constant 198 : index
    %144 = vector.load %arg10[%c0_164, %c198] : memref<8x324xf32, #tpu.memory_space<vmem>>, vector<8x1xf32>
    tpu.vector_store %arg10[%c0_164, %c198], %143 {strides = array<i32>} : memref<8x324xf32, #tpu.memory_space<vmem>>, vector<8x1xf32>,
    %c0_165 = arith.constant 0 : index
    %c213 = arith.constant 213 : index
    %145 = vector.load %arg10[%c0_165, %c213] : memref<8x324xf32, #tpu.memory_space<vmem>>, vector<8x1xf32>
    %c0_166 = arith.constant 0 : index
    %c215 = arith.constant 215 : index
    %146 = vector.load %arg10[%c0_166, %c215] : memref<8x324xf32, #tpu.memory_space<vmem>>, vector<8x1xf32>
    tpu.vector_store %arg10[%c0_166, %c215], %145 {strides = array<i32>} : memref<8x324xf32, #tpu.memory_space<vmem>>, vector<8x1xf32>,
    %c0_167 = arith.constant 0 : index
    %c218 = arith.constant 218 : index
    %147 = vector.load %arg10[%c0_167, %c218] : memref<8x324xf32, #tpu.memory_space<vmem>>, vector<8x1xf32>
    %c0_168 = arith.constant 0 : index
    %c216 = arith.constant 216 : index
    %148 = vector.load %arg10[%c0_168, %c216] : memref<8x324xf32, #tpu.memory_space<vmem>>, vector<8x1xf32>
    tpu.vector_store %arg10[%c0_168, %c216], %147 {strides = array<i32>} : memref<8x324xf32, #tpu.memory_space<vmem>>, vector<8x1xf32>,
    %c0_169 = arith.constant 0 : index
    %c231 = arith.constant 231 : index
    %149 = vector.load %arg10[%c0_169, %c231] : memref<8x324xf32, #tpu.memory_space<vmem>>, vector<8x1xf32>
    %c0_170 = arith.constant 0 : index
    %c233 = arith.constant 233 : index
    %150 = vector.load %arg10[%c0_170, %c233] : memref<8x324xf32, #tpu.memory_space<vmem>>, vector<8x1xf32>
    tpu.vector_store %arg10[%c0_170, %c233], %149 {strides = array<i32>} : memref<8x324xf32, #tpu.memory_space<vmem>>, vector<8x1xf32>,
    %c0_171 = arith.constant 0 : index
    %c236 = arith.constant 236 : index
    %151 = vector.load %arg10[%c0_171, %c236] : memref<8x324xf32, #tpu.memory_space<vmem>>, vector<8x1xf32>
    %c0_172 = arith.constant 0 : index
    %c234 = arith.constant 234 : index
    %152 = vector.load %arg10[%c0_172, %c234] : memref<8x324xf32, #tpu.memory_space<vmem>>, vector<8x1xf32>
    tpu.vector_store %arg10[%c0_172, %c234], %151 {strides = array<i32>} : memref<8x324xf32, #tpu.memory_space<vmem>>, vector<8x1xf32>,
    %c0_173 = arith.constant 0 : index
    %c249 = arith.constant 249 : index
    %153 = vector.load %arg10[%c0_173, %c249] : memref<8x324xf32, #tpu.memory_space<vmem>>, vector<8x1xf32>
    %c0_174 = arith.constant 0 : index
    %c251 = arith.constant 251 : index
    %154 = vector.load %arg10[%c0_174, %c251] : memref<8x324xf32, #tpu.memory_space<vmem>>, vector<8x1xf32>
    tpu.vector_store %arg10[%c0_174, %c251], %153 {strides = array<i32>} : memref<8x324xf32, #tpu.memory_space<vmem>>, vector<8x1xf32>,
    %c0_175 = arith.constant 0 : index
    %c254 = arith.constant 254 : index
    %155 = vector.load %arg10[%c0_175, %c254] : memref<8x324xf32, #tpu.memory_space<vmem>>, vector<8x1xf32>
    %c0_176 = arith.constant 0 : index
    %c252 = arith.constant 252 : index
    %156 = vector.load %arg10[%c0_176, %c252] : memref<8x324xf32, #tpu.memory_space<vmem>>, vector<8x1xf32>
    tpu.vector_store %arg10[%c0_176, %c252], %155 {strides = array<i32>} : memref<8x324xf32, #tpu.memory_space<vmem>>, vector<8x1xf32>,
    %c0_177 = arith.constant 0 : index
    %c267 = arith.constant 267 : index
    %157 = vector.load %arg10[%c0_177, %c267] : memref<8x324xf32, #tpu.memory_space<vmem>>, vector<8x1xf32>
    %c0_178 = arith.constant 0 : index
    %c269 = arith.constant 269 : index
    %158 = vector.load %arg10[%c0_178, %c269] : memref<8x324xf32, #tpu.memory_space<vmem>>, vector<8x1xf32>
    tpu.vector_store %arg10[%c0_178, %c269], %157 {strides = array<i32>} : memref<8x324xf32, #tpu.memory_space<vmem>>, vector<8x1xf32>,
    %c0_179 = arith.constant 0 : index
    %c272 = arith.constant 272 : index
    %159 = vector.load %arg10[%c0_179, %c272] : memref<8x324xf32, #tpu.memory_space<vmem>>, vector<8x1xf32>
    %c0_180 = arith.constant 0 : index
    %c270 = arith.constant 270 : index
    %160 = vector.load %arg10[%c0_180, %c270] : memref<8x324xf32, #tpu.memory_space<vmem>>, vector<8x1xf32>
    tpu.vector_store %arg10[%c0_180, %c270], %159 {strides = array<i32>} : memref<8x324xf32, #tpu.memory_space<vmem>>, vector<8x1xf32>,
    %c0_181 = arith.constant 0 : index
    %c285 = arith.constant 285 : index
    %161 = vector.load %arg10[%c0_181, %c285] : memref<8x324xf32, #tpu.memory_space<vmem>>, vector<8x1xf32>
    %c0_182 = arith.constant 0 : index
    %c287 = arith.constant 287 : index
    %162 = vector.load %arg10[%c0_182, %c287] : memref<8x324xf32, #tpu.memory_space<vmem>>, vector<8x1xf32>
    tpu.vector_store %arg10[%c0_182, %c287], %161 {strides = array<i32>} : memref<8x324xf32, #tpu.memory_space<vmem>>, vector<8x1xf32>,
    %c0_183 = arith.constant 0 : index
    %c290 = arith.constant 290 : index
    %163 = vector.load %arg10[%c0_183, %c290] : memref<8x324xf32, #tpu.memory_space<vmem>>, vector<8x1xf32>
    %c0_184 = arith.constant 0 : index
    %c288 = arith.constant 288 : index
    %164 = vector.load %arg10[%c0_184, %c288] : memref<8x324xf32, #tpu.memory_space<vmem>>, vector<8x1xf32>
    tpu.vector_store %arg10[%c0_184, %c288], %163 {strides = array<i32>} : memref<8x324xf32, #tpu.memory_space<vmem>>, vector<8x1xf32>,
    %c0_185 = arith.constant 0 : index
    %c303 = arith.constant 303 : index
    %165 = vector.load %arg10[%c0_185, %c303] : memref<8x324xf32, #tpu.memory_space<vmem>>, vector<8x1xf32>
    %c0_186 = arith.constant 0 : index
    %c305 = arith.constant 305 : index
    %166 = vector.load %arg10[%c0_186, %c305] : memref<8x324xf32, #tpu.memory_space<vmem>>, vector<8x1xf32>
    tpu.vector_store %arg10[%c0_186, %c305], %165 {strides = array<i32>} : memref<8x324xf32, #tpu.memory_space<vmem>>, vector<8x1xf32>,
    %c0_187 = arith.constant 0 : index
    %c308 = arith.constant 308 : index
    %167 = vector.load %arg10[%c0_187, %c308] : memref<8x324xf32, #tpu.memory_space<vmem>>, vector<8x1xf32>
    %c0_188 = arith.constant 0 : index
    %c306 = arith.constant 306 : index
    %168 = vector.load %arg10[%c0_188, %c306] : memref<8x324xf32, #tpu.memory_space<vmem>>, vector<8x1xf32>
    tpu.vector_store %arg10[%c0_188, %c306], %167 {strides = array<i32>} : memref<8x324xf32, #tpu.memory_space<vmem>>, vector<8x1xf32>,
    %c0_189 = arith.constant 0 : index
    %c321 = arith.constant 321 : index
    %169 = vector.load %arg10[%c0_189, %c321] : memref<8x324xf32, #tpu.memory_space<vmem>>, vector<8x1xf32>
    %c0_190 = arith.constant 0 : index
    %c323 = arith.constant 323 : index
    %170 = vector.load %arg10[%c0_190, %c323] : memref<8x324xf32, #tpu.memory_space<vmem>>, vector<8x1xf32>
    tpu.vector_store %arg10[%c0_190, %c323], %169 {strides = array<i32>} : memref<8x324xf32, #tpu.memory_space<vmem>>, vector<8x1xf32>,
    %c0_191 = arith.constant 0 : index
    %c0_192 = arith.constant 0 : index
    %171 = vector.load %arg12[%c0_191, %c0_192] : memref<8x286xf32, #tpu.memory_space<vmem>>, vector<8x286xf32>
    %c0_193 = arith.constant 0 : index
    %c0_194 = arith.constant 0 : index
    %c0_195 = arith.constant 0 : index
    %172 = vector.load %arg4[%c0_193, %c0_194, %c0_195] : memref<9x8x8xf32, #tpu.memory_space<vmem>>, vector<1x8x8xf32>
    %173 = vector.shape_cast %172 : vector<1x8x8xf32> to vector<8x8xf32>
    %c0_196 = arith.constant 0 : index
    %c0_197 = arith.constant 0 : index
    %174 = vector.load %arg10[%c0_196, %c0_197] : memref<8x324xf32, #tpu.memory_space<vmem>>, vector<8x286xf32>
    %cst_198 = arith.constant dense<0.000000e+00> : vector<8x286xf32>
    %175 = tpu.matmul %173, %174, %cst_198 {dimension_numbers = #tpu.dot_dimension_numbers<[1], [0], [0], [1], [0, 0, 1, 1], [], []>} : vector<8x8xf32>, vector<8x286xf32>, vector<8x286xf32> -> vector<8x286xf32>
    %176 = arith.addf %171, %175 : vector<8x286xf32>
    %c0_199 = arith.constant 0 : index
    %c0_200 = arith.constant 0 : index
    %177 = vector.load %arg12[%c0_199, %c0_200] : memref<8x286xf32, #tpu.memory_space<vmem>>, vector<8x286xf32>
    tpu.vector_store %arg12[%c0_199, %c0_200], %176 {strides = array<i32>} : memref<8x286xf32, #tpu.memory_space<vmem>>, vector<8x286xf32>,
    %c0_201 = arith.constant 0 : index
    %c0_202 = arith.constant 0 : index
    %178 = vector.load %arg12[%c0_201, %c0_202] : memref<8x286xf32, #tpu.memory_space<vmem>>, vector<8x286xf32>
    %c1_203 = arith.constant 1 : index
    %c0_204 = arith.constant 0 : index
    %c0_205 = arith.constant 0 : index
    %179 = vector.load %arg4[%c1_203, %c0_204, %c0_205] : memref<9x8x8xf32, #tpu.memory_space<vmem>>, vector<1x8x8xf32>
    %180 = vector.shape_cast %179 : vector<1x8x8xf32> to vector<8x8xf32>
    %c0_206 = arith.constant 0 : index
    %c1_207 = arith.constant 1 : index
    %181 = vector.load %arg10[%c0_206, %c1_207] : memref<8x324xf32, #tpu.memory_space<vmem>>, vector<8x286xf32>
    %cst_208 = arith.constant dense<0.000000e+00> : vector<8x286xf32>
    %182 = tpu.matmul %180, %181, %cst_208 {dimension_numbers = #tpu.dot_dimension_numbers<[1], [0], [0], [1], [0, 0, 1, 1], [], []>} : vector<8x8xf32>, vector<8x286xf32>, vector<8x286xf32> -> vector<8x286xf32>
    %183 = arith.addf %178, %182 : vector<8x286xf32>
    %c0_209 = arith.constant 0 : index
    %c0_210 = arith.constant 0 : index
    %184 = vector.load %arg12[%c0_209, %c0_210] : memref<8x286xf32, #tpu.memory_space<vmem>>, vector<8x286xf32>
    tpu.vector_store %arg12[%c0_209, %c0_210], %183 {strides = array<i32>} : memref<8x286xf32, #tpu.memory_space<vmem>>, vector<8x286xf32>,
    %c0_211 = arith.constant 0 : index
    %c0_212 = arith.constant 0 : index
    %185 = vector.load %arg12[%c0_211, %c0_212] : memref<8x286xf32, #tpu.memory_space<vmem>>, vector<8x286xf32>
    %c2_213 = arith.constant 2 : index
    %c0_214 = arith.constant 0 : index
    %c0_215 = arith.constant 0 : index
    %186 = vector.load %arg4[%c2_213, %c0_214, %c0_215] : memref<9x8x8xf32, #tpu.memory_space<vmem>>, vector<1x8x8xf32>
    %187 = vector.shape_cast %186 : vector<1x8x8xf32> to vector<8x8xf32>
    %c0_216 = arith.constant 0 : index
    %c2_217 = arith.constant 2 : index
    %188 = vector.load %arg10[%c0_216, %c2_217] : memref<8x324xf32, #tpu.memory_space<vmem>>, vector<8x286xf32>
    %cst_218 = arith.constant dense<0.000000e+00> : vector<8x286xf32>
    %189 = tpu.matmul %187, %188, %cst_218 {dimension_numbers = #tpu.dot_dimension_numbers<[1], [0], [0], [1], [0, 0, 1, 1], [], []>} : vector<8x8xf32>, vector<8x286xf32>, vector<8x286xf32> -> vector<8x286xf32>
    %190 = arith.addf %185, %189 : vector<8x286xf32>
    %c0_219 = arith.constant 0 : index
    %c0_220 = arith.constant 0 : index
    %191 = vector.load %arg12[%c0_219, %c0_220] : memref<8x286xf32, #tpu.memory_space<vmem>>, vector<8x286xf32>
    tpu.vector_store %arg12[%c0_219, %c0_220], %190 {strides = array<i32>} : memref<8x286xf32, #tpu.memory_space<vmem>>, vector<8x286xf32>,
    %c0_221 = arith.constant 0 : index
    %c0_222 = arith.constant 0 : index
    %192 = vector.load %arg12[%c0_221, %c0_222] : memref<8x286xf32, #tpu.memory_space<vmem>>, vector<8x286xf32>
    %c3_223 = arith.constant 3 : index
    %c0_224 = arith.constant 0 : index
    %c0_225 = arith.constant 0 : index
    %193 = vector.load %arg4[%c3_223, %c0_224, %c0_225] : memref<9x8x8xf32, #tpu.memory_space<vmem>>, vector<1x8x8xf32>
    %194 = vector.shape_cast %193 : vector<1x8x8xf32> to vector<8x8xf32>
    %c0_226 = arith.constant 0 : index
    %c18_227 = arith.constant 18 : index
    %195 = vector.load %arg10[%c0_226, %c18_227] : memref<8x324xf32, #tpu.memory_space<vmem>>, vector<8x286xf32>
    %cst_228 = arith.constant dense<0.000000e+00> : vector<8x286xf32>
    %196 = tpu.matmul %194, %195, %cst_228 {dimension_numbers = #tpu.dot_dimension_numbers<[1], [0], [0], [1], [0, 0, 1, 1], [], []>} : vector<8x8xf32>, vector<8x286xf32>, vector<8x286xf32> -> vector<8x286xf32>
    %197 = arith.addf %192, %196 : vector<8x286xf32>
    %c0_229 = arith.constant 0 : index
    %c0_230 = arith.constant 0 : index
    %198 = vector.load %arg12[%c0_229, %c0_230] : memref<8x286xf32, #tpu.memory_space<vmem>>, vector<8x286xf32>
    tpu.vector_store %arg12[%c0_229, %c0_230], %197 {strides = array<i32>} : memref<8x286xf32, #tpu.memory_space<vmem>>, vector<8x286xf32>,
    %c0_231 = arith.constant 0 : index
    %c0_232 = arith.constant 0 : index
    %199 = vector.load %arg12[%c0_231, %c0_232] : memref<8x286xf32, #tpu.memory_space<vmem>>, vector<8x286xf32>
    %c4_233 = arith.constant 4 : index
    %c0_234 = arith.constant 0 : index
    %c0_235 = arith.constant 0 : index
    %200 = vector.load %arg4[%c4_233, %c0_234, %c0_235] : memref<9x8x8xf32, #tpu.memory_space<vmem>>, vector<1x8x8xf32>
    %201 = vector.shape_cast %200 : vector<1x8x8xf32> to vector<8x8xf32>
    %c0_236 = arith.constant 0 : index
    %c19_237 = arith.constant 19 : index
    %202 = vector.load %arg10[%c0_236, %c19_237] : memref<8x324xf32, #tpu.memory_space<vmem>>, vector<8x286xf32>
    %cst_238 = arith.constant dense<0.000000e+00> : vector<8x286xf32>
    %203 = tpu.matmul %201, %202, %cst_238 {dimension_numbers = #tpu.dot_dimension_numbers<[1], [0], [0], [1], [0, 0, 1, 1], [], []>} : vector<8x8xf32>, vector<8x286xf32>, vector<8x286xf32> -> vector<8x286xf32>
    %204 = arith.addf %199, %203 : vector<8x286xf32>
    %c0_239 = arith.constant 0 : index
    %c0_240 = arith.constant 0 : index
    %205 = vector.load %arg12[%c0_239, %c0_240] : memref<8x286xf32, #tpu.memory_space<vmem>>, vector<8x286xf32>
    tpu.vector_store %arg12[%c0_239, %c0_240], %204 {strides = array<i32>} : memref<8x286xf32, #tpu.memory_space<vmem>>, vector<8x286xf32>,
    %c0_241 = arith.constant 0 : index
    %c0_242 = arith.constant 0 : index
    %206 = vector.load %arg12[%c0_241, %c0_242] : memref<8x286xf32, #tpu.memory_space<vmem>>, vector<8x286xf32>
    %c5_243 = arith.constant 5 : index
    %c0_244 = arith.constant 0 : index
    %c0_245 = arith.constant 0 : index
    %207 = vector.load %arg4[%c5_243, %c0_244, %c0_245] : memref<9x8x8xf32, #tpu.memory_space<vmem>>, vector<1x8x8xf32>
    %208 = vector.shape_cast %207 : vector<1x8x8xf32> to vector<8x8xf32>
    %c0_246 = arith.constant 0 : index
    %c20_247 = arith.constant 20 : index
    %209 = vector.load %arg10[%c0_246, %c20_247] : memref<8x324xf32, #tpu.memory_space<vmem>>, vector<8x286xf32>
    %cst_248 = arith.constant dense<0.000000e+00> : vector<8x286xf32>
    %210 = tpu.matmul %208, %209, %cst_248 {dimension_numbers = #tpu.dot_dimension_numbers<[1], [0], [0], [1], [0, 0, 1, 1], [], []>} : vector<8x8xf32>, vector<8x286xf32>, vector<8x286xf32> -> vector<8x286xf32>
    %211 = arith.addf %206, %210 : vector<8x286xf32>
    %c0_249 = arith.constant 0 : index
    %c0_250 = arith.constant 0 : index
    %212 = vector.load %arg12[%c0_249, %c0_250] : memref<8x286xf32, #tpu.memory_space<vmem>>, vector<8x286xf32>
    tpu.vector_store %arg12[%c0_249, %c0_250], %211 {strides = array<i32>} : memref<8x286xf32, #tpu.memory_space<vmem>>, vector<8x286xf32>,
    %c0_251 = arith.constant 0 : index
    %c0_252 = arith.constant 0 : index
    %213 = vector.load %arg12[%c0_251, %c0_252] : memref<8x286xf32, #tpu.memory_space<vmem>>, vector<8x286xf32>
    %c6_253 = arith.constant 6 : index
    %c0_254 = arith.constant 0 : index
    %c0_255 = arith.constant 0 : index
    %214 = vector.load %arg4[%c6_253, %c0_254, %c0_255] : memref<9x8x8xf32, #tpu.memory_space<vmem>>, vector<1x8x8xf32>
    %215 = vector.shape_cast %214 : vector<1x8x8xf32> to vector<8x8xf32>
    %c0_256 = arith.constant 0 : index
    %c36_257 = arith.constant 36 : index
    %216 = vector.load %arg10[%c0_256, %c36_257] : memref<8x324xf32, #tpu.memory_space<vmem>>, vector<8x286xf32>
    %cst_258 = arith.constant dense<0.000000e+00> : vector<8x286xf32>
    %217 = tpu.matmul %215, %216, %cst_258 {dimension_numbers = #tpu.dot_dimension_numbers<[1], [0], [0], [1], [0, 0, 1, 1], [], []>} : vector<8x8xf32>, vector<8x286xf32>, vector<8x286xf32> -> vector<8x286xf32>
    %218 = arith.addf %213, %217 : vector<8x286xf32>
    %c0_259 = arith.constant 0 : index
    %c0_260 = arith.constant 0 : index
    %219 = vector.load %arg12[%c0_259, %c0_260] : memref<8x286xf32, #tpu.memory_space<vmem>>, vector<8x286xf32>
    tpu.vector_store %arg12[%c0_259, %c0_260], %218 {strides = array<i32>} : memref<8x286xf32, #tpu.memory_space<vmem>>, vector<8x286xf32>,
    %c0_261 = arith.constant 0 : index
    %c0_262 = arith.constant 0 : index
    %220 = vector.load %arg12[%c0_261, %c0_262] : memref<8x286xf32, #tpu.memory_space<vmem>>, vector<8x286xf32>
    %c7_263 = arith.constant 7 : index
    %c0_264 = arith.constant 0 : index
    %c0_265 = arith.constant 0 : index
    %221 = vector.load %arg4[%c7_263, %c0_264, %c0_265] : memref<9x8x8xf32, #tpu.memory_space<vmem>>, vector<1x8x8xf32>
    %222 = vector.shape_cast %221 : vector<1x8x8xf32> to vector<8x8xf32>
    %c0_266 = arith.constant 0 : index
    %c37_267 = arith.constant 37 : index
    %223 = vector.load %arg10[%c0_266, %c37_267] : memref<8x324xf32, #tpu.memory_space<vmem>>, vector<8x286xf32>
    %cst_268 = arith.constant dense<0.000000e+00> : vector<8x286xf32>
    %224 = tpu.matmul %222, %223, %cst_268 {dimension_numbers = #tpu.dot_dimension_numbers<[1], [0], [0], [1], [0, 0, 1, 1], [], []>} : vector<8x8xf32>, vector<8x286xf32>, vector<8x286xf32> -> vector<8x286xf32>
    %225 = arith.addf %220, %224 : vector<8x286xf32>
    %c0_269 = arith.constant 0 : index
    %c0_270 = arith.constant 0 : index
    %226 = vector.load %arg12[%c0_269, %c0_270] : memref<8x286xf32, #tpu.memory_space<vmem>>, vector<8x286xf32>
    tpu.vector_store %arg12[%c0_269, %c0_270], %225 {strides = array<i32>} : memref<8x286xf32, #tpu.memory_space<vmem>>, vector<8x286xf32>,
    %c0_271 = arith.constant 0 : index
    %c0_272 = arith.constant 0 : index
    %227 = vector.load %arg12[%c0_271, %c0_272] : memref<8x286xf32, #tpu.memory_space<vmem>>, vector<8x286xf32>
    %c8_273 = arith.constant 8 : index
    %c0_274 = arith.constant 0 : index
    %c0_275 = arith.constant 0 : index
    %228 = vector.load %arg4[%c8_273, %c0_274, %c0_275] : memref<9x8x8xf32, #tpu.memory_space<vmem>>, vector<1x8x8xf32>
    %229 = vector.shape_cast %228 : vector<1x8x8xf32> to vector<8x8xf32>
    %c0_276 = arith.constant 0 : index
    %c38_277 = arith.constant 38 : index
    %230 = vector.load %arg10[%c0_276, %c38_277] : memref<8x324xf32, #tpu.memory_space<vmem>>, vector<8x286xf32>
    %cst_278 = arith.constant dense<0.000000e+00> : vector<8x286xf32>
    %231 = tpu.matmul %229, %230, %cst_278 {dimension_numbers = #tpu.dot_dimension_numbers<[1], [0], [0], [1], [0, 0, 1, 1], [], []>} : vector<8x8xf32>, vector<8x286xf32>, vector<8x286xf32> -> vector<8x286xf32>
    %232 = arith.addf %227, %231 : vector<8x286xf32>
    %c0_279 = arith.constant 0 : index
    %c0_280 = arith.constant 0 : index
    %233 = vector.load %arg12[%c0_279, %c0_280] : memref<8x286xf32, #tpu.memory_space<vmem>>, vector<8x286xf32>
    tpu.vector_store %arg12[%c0_279, %c0_280], %232 {strides = array<i32>} : memref<8x286xf32, #tpu.memory_space<vmem>>, vector<8x286xf32>,
    %c0_281 = arith.constant 0 : index
    %c0_282 = arith.constant 0 : index
    %234 = vector.load %arg12[%c0_281, %c0_282] : memref<8x286xf32, #tpu.memory_space<vmem>>, vector<8x286xf32>
    %c0_283 = arith.constant 0 : index
    %c0_284 = arith.constant 0 : index
    %235 = vector.load %arg8[%c0_283, %c0_284] : memref<286x64xf32, #tpu.memory_space<vmem>>, vector<286x64xf32>
    %cst_285 = arith.constant dense<0.000000e+00> : vector<8x64xf32>
    %236 = tpu.matmul %234, %235, %cst_285 {dimension_numbers = #tpu.dot_dimension_numbers<[1], [0], [0], [1], [0, 0, 1, 1], [], []>} : vector<8x286xf32>, vector<286x64xf32>, vector<8x64xf32> -> vector<8x64xf32>
    %c0_286 = arith.constant 0 : index
    %c0_287 = arith.constant 0 : index
    %c0_288 = arith.constant 0 : index
    %237 = vector.load %arg9[%c0_286, %c0_287, %c0_288] : memref<1x8x64xf32, #tpu.memory_space<vmem>>, vector<1x8x64xf32>
    %238 = vector.shape_cast %237 : vector<1x8x64xf32> to vector<8x64xf32>
    %239 = vector.shape_cast %236 : vector<8x64xf32> to vector<1x8x64xf32>
    tpu.vector_store %arg9[%c0_286, %c0_287, %c0_288], %239 {strides = array<i32>} : memref<1x8x64xf32, #tpu.memory_space<vmem>>, vector<1x8x64xf32>,
    return
  }
  func.func @transform_0(%arg0: i32) -> (i32, i32, i32) {
    %c0_i32 = arith.constant 0 : i32
    %c0_i32_0 = arith.constant 0 : i32
    %c0_i32_1 = arith.constant 0 : i32
    return %arg0, %c0_i32, %c0_i32_0 : i32, i32, i32
  }
  func.func @transform_1(%arg0: i32) -> (i32, i32, i32) {
    %c0_i32 = arith.constant 0 : i32
    %c0_i32_0 = arith.constant 0 : i32
    %c0_i32_1 = arith.constant 0 : i32
    %c0_i32_2 = arith.constant 0 : i32
    return %c0_i32, %c0_i32_0, %c0_i32_1 : i32, i32, i32
  }
  func.func @transform_2(%arg0: i32) -> (i32, i32) {
    %c0_i32 = arith.constant 0 : i32
    %c0_i32_0 = arith.constant 0 : i32
    %c0_i32_1 = arith.constant 0 : i32
    return %c0_i32, %c0_i32_0 : i32, i32
  }
  func.func @transform_3(%arg0: i32) -> (i32, i32, i32) {
    %c0_i32 = arith.constant 0 : i32
    %c0_i32_0 = arith.constant 0 : i32
    %c0_i32_1 = arith.constant 0 : i32
    %c0_i32_2 = arith.constant 0 : i32
    return %c0_i32, %c0_i32_0, %c0_i32_1 : i32, i32, i32
  }
  func.func @transform_4(%arg0: i32) -> (i32, i32) {
    %c0_i32 = arith.constant 0 : i32
    %c0_i32_0 = arith.constant 0 : i32
    %c0_i32_1 = arith.constant 0 : i32
    return %c0_i32, %c0_i32_0 : i32, i32
  }
  func.func @transform_5(%arg0: i32) -> (i32, i32) {
    %c0_i32 = arith.constant 0 : i32
    %c0_i32_0 = arith.constant 0 : i32
    %c0_i32_1 = arith.constant 0 : i32
    return %c0_i32, %c0_i32_0 : i32, i32
  }
  func.func @transform_6(%arg0: i32) -> (i32, i32) {
    %c0_i32 = arith.constant 0 : i32
    %c0_i32_0 = arith.constant 0 : i32
    %c0_i32_1 = arith.constant 0 : i32
    return %c0_i32, %c0_i32_0 : i32, i32
  }
  func.func @transform_7(%arg0: i32) -> (i32, i32) {
    %c0_i32 = arith.constant 0 : i32
    %c0_i32_0 = arith.constant 0 : i32
    %c0_i32_1 = arith.constant 0 : i32
    return %c0_i32, %c0_i32_0 : i32, i32
  }
  func.func @transform_8(%arg0: i32) -> (i32, i32, i32) {
    %c0_i32 = arith.constant 0 : i32
    %c0_i32_0 = arith.constant 0 : i32
    %c0_i32_1 = arith.constant 0 : i32
    return %arg0, %c0_i32, %c0_i32_0 : i32, i32, i32
  }
}

</mosaic_0001>

<bundles_post_ra>
// kernel: tpu_custom_call.1
= control target key start
LH: loop header
LB: loop body
LE: loop exit
PB: predicated region body
PF: predicated region fallthrough
CT: control target
= control target key end

     0   :  { %13 = vsyncpa [#allocation6], 0  ;;  %s5283_s0 = inlined_call_operand.vmem [shape: f32[2,4,324], index: 0, kind: input, shape index: {}]   ;;  %s5284_s1 = inlined_call_operand.vmem [shape: f32[9,8,4], index: 1, kind: input, shape index: {}]   ;;  %s5285_s2 = inlined_call_operand.vmem [shape: f32[8,1], index: 2, kind: input, shape index: {}]   ;;  %s5286_s3 = inlined_call_operand.vmem [shape: f32[9,8,8], index: 3, kind: input, shape index: {}]   ;;  %s5287_s4 = inlined_call_operand.vmem [shape: f32[8,1], index: 4, kind: input, shape index: {}]   ;;  %s5288_s5 = inlined_call_operand.vmem [shape: f32[8,4], index: 5, kind: input, shape index: {}]   ;;  %s5289_s6 = inlined_call_operand.vmem [shape: f32[8,1], index: 6, kind: input, shape index: {}]   ;;  %s5290_s7 = inlined_call_operand.vmem [shape: f32[286,64], index: 7, kind: input, shape index: {}]   ;;  %s5291_s8 = inlined_call_operand.hbm [shape: f32[2,8,64], index: 8, kind: output, shape index: {}]  }
   0x1   :  { %15 = vsyncpa [#allocation6 + $0x1], 0  ;;  %s4651_s27 = smov 0   ;;  %s4653_s28 = smov 0  }
   0x2   :  { %s4655_s29 = smov 0   ;;  %s4657_s30 = smov 0  }
   0x3 LB: > { %s4672_s9 = sadd.s32 4294967295, %s4587_s30   ;;  %s4148_s10 = sadd.s32 4294967294, %s4587_s30   ;;  %s4587_s30 = sphi %s4657_s30, %s5297_s30   ;;  %s4583_s29 = sphi %s4655_s29, %s5296_s29   ;;  %s4579_s28 = sphi %s4653_s28, %s5295_s28   ;;  %s4575_s27 = sphi %s4651_s27, %s5294_s27  }
   0x4   : > { %s4676_s11 = sadd.s32 1, %s4587_s30   ;;  %s201_s12 = sadd.s32 1, %s4583_s29 }
   0x5   : > { %s198_s13 = ssub.s32 %s4587_s30, %s4676_s11  ;;  %p211_p0 = scmp.ne.s32.totalorder %s4583_s29, %s4579_s28 }
   0x6   : > { %p199_p1 = scmp.eq.s32.totalorder %s198_s13, 0  ;;  %p212_p2 = scmp.eq.s32.totalorder %s4672_s9, 1 }
   0x7   : > { %p217_p3 = scmp.ne.s32.totalorder %s4579_s28, %s4575_s27  ;;  %p218_p4 = scmp.eq.s32.totalorder %s4148_s10, 1 }
   0x8   : > { %s4687_s14 = scalar_select %p199_p1, %s4583_s29, %s201_s12  }
   0x9   : > { %p4689_p5 = por %p212_p2, %p211_p0  ;;  %p4693_p6 = por %p218_p4, %p217_p3 }
   0xa   : > { %p4151_p7 = scmp.ge.s32.totalorder %s4587_s30, 1  ;;  %p265_p8 = scmp.lt.s32.totalorder %s4587_s30, 3 }
   0xc   : > { %p266_p9 = pnand %p4151_p7, %p265_p8 }
   0xd   : > { %p299_p10 = scmp.lt.s32.totalorder (!%p266_p9), %s4672_s9, 1  ;;  %v4589_v0 = vmov (!%p266_p9), 0.0   ;;  %vm495_vm0 = vcmask (!%p266_p9), 551936   ;;  %s4590_s22 = smov (!%p266_p9), 109   ;;  %v4597_v15 = vmov (!%p266_p9), 0   ;;  %v500_v17 = vld [vmem:[%s5285_s2] sm:$0xff] (!%p266_p9) }
   0xe   : > { %269 = sbr.rel (%p266_p9) target bundleno = 3023 (0xbcf), region = 52  ;;  %400 = vmatprep.mubr.f32.mxu1 (!%p266_p9), %v4589_v0  ;;  %929 = vmatprep.mubr.f32.mxu0 (!%p266_p9), %v4589_v0  ;;  %s4591_s23 = smov (!%p266_p9), 127   ;;  %vm322_vm1 = vcmask (!%p266_p9), 891904   ;;  %vm329_vm2 = vcmask (!%p266_p9), 1043456   ;;  %v304_v23 = vld [vmem:[%s5288_s5] sm:$0xff] (!%p266_p9)  ;;  %vm325_vm3 = vcmask (!%p266_p9), 31744  }
   0xf   : > { %s4592_s24 = smov (!%p266_p9), 126   ;;  %s4593_s25 = smov (!%p266_p9), 110   ;;  %4524 = vset.pattern.permute.xlu0 (!%p266_p9), %v4597_v15  ;;  %4523 = vset.pattern.permute.xlu1 (!%p266_p9), %v4597_v15  ;;  %vm4599_vm4 = vmmov (!%p266_p9), 0   ;;  %vm853_vm5 = vcmask (!%p266_p9), 1031168   ;;  %v497_v29 = vld [vmem:[%s5284_s1] sm:$0xff] (!%p266_p9)  ;;  %vm678_vm6 = vcmask (!%p266_p9), 1039360  }
  0x10   : > { %s4594_s26 = smov (!%p266_p9), 108   ;;  %s4595_s10 = smov (!%p266_p9), 92   ;;  %v4170_v34 = vld [vmem:[%s5284_s1 + $0x10] sm:$0xff] (!%p266_p9)  ;;  %vm1028_vm7 = vcmask (!%p266_p9), 900096   ;;  %v4164_v40 = vld [vmem:[%s5284_s1 + $0x8] sm:$0xff] (!%p266_p9)  ;;  %v4176_v42 = vld [vmem:[%s5284_s1 + $0x18] sm:$0xff] (!%p266_p9) }
  0x11   : > { %s4596_s12 = smov (!%p266_p9), 91   ;;  %s4598_s13 = smov (!%p266_p9), 90   ;;  %v4182_v49 = vld [vmem:[%s5284_s1 + $0x20] sm:$0xff] (!%p266_p9)  ;;  %vm1377_vm8 = vcmask (!%p266_p9), 883712   ;;  %v4188_v54 = vld [vmem:[%s5284_s1 + $0x28] sm:$0xff] (!%p266_p9)  ;;  %vm1552_vm9 = vcmask (!%p266_p9), 752640  }
  0x12   : > { %v4194_v61 = vld [vmem:[%s5284_s1 + $0x30] sm:$0xff] (!%p266_p9)  ;;  %vm1727_vm10 = vcmask (!%p266_p9), 744448   ;;  %vm1902_vm11 = vcmask (!%p266_p9), 736256   ;;  %vm488_vm12 = vcmask (!%p266_p9), 244736   ;;  %s4600_s20 = smov (!%p266_p9), 19   ;;  %vm2082_vm13 = vcmask (!%p266_p9), 1047704  }
  0x13   : > { %vm2076_vm14 = vcmask (!%p266_p9), 154624   ;;  %vm2092_vm15 = vcmask (!%p266_p9), 138248  }
  0x15   : > { %s300_s17 = scalar_select %p299_p10, %s4672_s9, 1 }
  0x17   : > { %s4467_s18 = smul.u32 12, %s300_s17  ;;  %s4602_s17 = smov 36  }
  0x19   : > { %s4706_s21 = scalar_lea.vmem %s5283_s0, %s4467_s18 }
  0x1a   : > { %v305_v1 = vld [vmem:[%s4706_s21] sm:$0xff]  ;;  %v306_v2 = vld [vmem:[%s4706_s21 + $0x8] sm:$0xf] }
  0x1b   : > { %v491_v3 = vld [vmem:[%s4706_s21 + $0x8] sm:$0xf]  ;;  %v4711_v4 = vmax.f32 %v305_v1, 0.0  ;;  %316 = vrot.lane.b32.xlu1 %v305_v1, %s4590_s22  ;;  %v315_v5 = vcombine.high %v305_v1, %v305_v1 }
  0x1c   : > { %v493_v6 = vmax.f32 %v491_v3, 0.0  ;;  %v4200_v3 = vld [vmem:[%s5284_s1 + $0x38] sm:$0xff] }
  0x1d   : > { %494 = vst [vmem:[%s4706_s21] sm:$0xff] %v4711_v4  ;;  %318 = vrot.lane.b32.xlu0 %v315_v5, %s4590_s22  ;;  %v4720_v7 = vcombine.high %v4711_v4, %v4711_v4 }
  0x1e   : > { %496 = vst.msk [vmem:[%s4706_s21 + $0x8] sm:$0xf] %vm495_vm0, %v493_v6  ;;  %vm2211_vm0 = vcmask 130168  }
  0x1f   : > { %674 = vrot.lane.b32.xlu1 %v4720_v7, %s4591_s23 }
  0x21   : > { %320 = vrot.lane.b32.xlu0 %v306_v2, %s4590_s22 }
  0x23   : > { %672 = vrot.lane.b32.xlu1 %v4711_v4, %s4591_s23 }
  0x25   : > { %v668_v8 = vld [vmem:[%s4706_s21 + $0x8] sm:$0xf] }
  0x26   : > { %v843_v9 = vld [vmem:[%s4706_s21 + $0x8] sm:$0xf]  ;;  %676 = vrot.lane.b32.xlu0 %v668_v8, %s4591_s23 }
  0x27   : > { %851 = vrot.lane.b32.xlu1 %v843_v9, %s4592_s24  ;;  %v1018_v10 = vld [vmem:[%s4706_s21 + $0x8] sm:$0xf]  ;;  %v4206_v9 = vld [vmem:[%s5284_s1 + $0x40] sm:$0xff] }
  0x28   : > { %v1193_v11 = vld [vmem:[%s4706_s21 + $0x8] sm:$0xf] }
  0x29   : > { %v1367_v12 = vld [vmem:[%s4706_s21 + $0x8] sm:$0xf] }
  0x2a   : > { %849 = vrot.lane.b32.xlu0 %v4720_v7, %s4592_s24  ;;  %v1542_v13 = vld [vmem:[%s4706_s21 + $0x8] sm:$0xf] }
  0x2b   : > { %1024 = vrot.lane.b32.xlu1 %v4720_v7, %s4593_s25  ;;  %v1717_v14 = vld [vmem:[%s4706_s21 + $0x8] sm:$0xf] }
  0x2c   : > { %v1892_v16 = vld [vmem:[%s4706_s21 + $0x8] sm:$0xf] }
  0x2d   : > { %v499_v31 = vld [vmem:[%s4706_s21 + $0x8] sm:$0xf]  ;;  %s4601_s21 = smov 2  }
  0x2e   : > { %847 = vrot.lane.b32.xlu0 %v4711_v4, %s4592_s24 }
  0x2f   : > { %1022 = vrot.lane.b32.xlu1 %v4711_v4, %s4593_s25 }
  0x32   : > { %1026 = vrot.lane.b32.xlu0 %v1018_v10, %s4593_s25 }
  0x33   : > { %1201 = vrot.lane.b32.xlu1 %v1193_v11, %s4590_s22 }
  0x36   : > { %1199 = vrot.lane.b32.xlu0 %v4720_v7, %s4590_s22 }
  0x37   : > { %1373 = vrot.lane.b32.xlu1 %v4720_v7, %s4594_s26 }
  0x3a   : > { %1197 = vrot.lane.b32.xlu0 %v4711_v4, %s4590_s22 }
  0x3b   : > { %1371 = vrot.lane.b32.xlu1 %v4711_v4, %s4594_s26 }
  0x3e   : > { %1375 = vrot.lane.b32.xlu0 %v1367_v12, %s4594_s26 }
  0x3f   : > { %1550 = vrot.lane.b32.xlu1 %v1542_v13, %s4595_s10 }
  0x42   : > { %1548 = vrot.lane.b32.xlu0 %v4720_v7, %s4595_s10 }
  0x43   : > { %1723 = vrot.lane.b32.xlu1 %v4720_v7, %s4596_s12 }
  0x46   : > { %1546 = vrot.lane.b32.xlu0 %v4711_v4, %s4595_s10 }
  0x47   : > { %1721 = vrot.lane.b32.xlu1 %v4711_v4, %s4596_s12 }
  0x4a   : > { %1725 = vrot.lane.b32.xlu0 %v1717_v14, %s4596_s12 }
  0x4b   : > { %1900 = vrot.lane.b32.xlu1 %v1892_v16, %s4598_s13 }
  0x4e   : > { %1898 = vrot.lane.b32.xlu0 %v4720_v7, %s4598_s13 }
  0x4f   : > { %503 = vperm.xlu1 %4523, %v500_v17  }
  0x52   : > { %1896 = vrot.lane.b32.xlu0 %v4711_v4, %s4598_s13 }
  0x8d   : > { %v317_v18 = vpop.permute.xlu1 %316 }
  0x8f   : > { %v319_v19 = vpop.permute.xlu0 %318 }
  0x90   : > { %v323_v24 = vsel %vm322_vm1, %v317_v18, %v319_v19 }
  0x91   : > { %v675_v20 = vpop.permute.xlu1 %674 }
  0x93   : > { %v321_v21 = vpop.permute.xlu0 %320 }
  0x94   : > { %v324_v22 = vsel %vm322_vm1, %v319_v19, %v321_v21 }
  0x95   : > { %4154 = vmatprep.subr.msk.mxu1 %vm329_vm2, %v324_v22  ;;  %v673_v25 = vpop.permute.xlu1 %672 }
  0x96   : > { %4155 = vmatpush1.msk.msra.mxu1 %vm329_vm2, %v323_v24  ;;  %v679_v38 = vsel %vm678_vm6, %v673_v25, %v675_v20 }
  0x97   : > { %4156 = vmatmul.mubr.msk.f32.vlgmr.msra.gmra.mrb[0].mxu1 %vm325_vm3, %v304_v23  ;;  %4322 = vmatprep.subr.mxu1 %v4589_v0 }
  0x98   : > { %v677_v26 = vpop.permute.xlu0 %676  ;;  %4323 = vmatpush3.msk.msra.mxu1 %vm329_vm2, %v321_v21  ;;  %4324 = vmatprep.mubr.msk.f32.mxu1 %vm4599_vm4, %v4589_v0 }
  0x99   : > { %4159 = vmatprep.subr.msk.mxu1 %vm329_vm2, %v4720_v7  ;;  %v852_v27 = vpop.permute.xlu1 %851  ;;  %v680_v35 = vsel %vm678_vm6, %v675_v20, %v677_v26 }
  0x9b   : > { %4325 = vmatmul.mubr.msk.f32.vlgmr.msra.gmra.mrb[2].mxu1 %vm325_vm3, %v304_v23 }
  0x9c   : > { %v850_v28 = vpop.permute.xlu0 %849  ;;  %4160 = vmatpush1.msk.msra.mxu1 %vm329_vm2, %v4711_v4  ;;  %582 = vmatprep.mubr.f32.mxu1 %v4589_v0 }
  0x9d   : > { %v855_v30 = vsel %vm853_vm5, %v850_v28, %v852_v27  ;;  %4327 = vmatprep.subr.mxu1 %v4589_v0  ;;  %v1025_v32 = vpop.permute.xlu1 %1024 }
  0x9e   : > { %4171 = vmatprep.subr.msk.mxu0 %vm329_vm2, %v855_v30 }
  0x9f   : > { %4161 = vmatmul.mubr.msk.f32.vlgmr.msra.gmra.mrb[4].mxu1 %vm325_vm3, %v497_v29 }
  0xa0   : > { %v848_v33 = vpop.permute.xlu0 %847  ;;  %4328 = vmatpush3.msk.msra.mxu1 %vm329_vm2, %v499_v31  ;;  %4329 = vmatprep.mubr.msk.f32.mxu1 %vm4599_vm4, %v4589_v0 }
  0xa1   : > { %v854_v36 = vsel %vm853_vm5, %v848_v33, %v850_v28  ;;  %4165 = vmatprep.subr.msk.mxu1 %vm329_vm2, %v680_v35  ;;  %v1023_v37 = vpop.permute.xlu1 %1022 }
  0xa2   : > { %4172 = vmatpush1.msk.msra.mxu0 %vm329_vm2, %v854_v36  ;;  %v1029_v43 = vsel %vm1028_vm7, %v1023_v37, %v1025_v32 }
  0xa3   : > { %4173 = vmatmul.mubr.msk.f32.vlgmr.msra.gmra.mrb[0].mxu0 %vm325_vm3, %v4170_v34  ;;  %4330 = vmatmul.mubr.msk.f32.vlgmr.msra.gmra.mrb[6].mxu1 %vm325_vm3, %v497_v29 }
  0xa4   : > { %v1027_v39 = vpop.permute.xlu0 %1026  ;;  %1104 = vmatprep.mubr.f32.mxu0 %v4589_v0  ;;  %4166 = vmatpush1.msk.msra.mxu1 %vm329_vm2, %v679_v38 }
  0xa5   : > { %754 = vmatprep.mubr.f32.mxu1 %v4589_v0  ;;  %v1030_v41 = vsel %vm1028_vm7, %v1025_v32, %v1027_v39  ;;  %4332 = vmatprep.subr.mxu1 %v4589_v0  ;;  %v1202_v44 = vpop.permute.xlu1 %1201 }
  0xa6   : > { %4177 = vmatprep.subr.msk.mxu0 %vm329_vm2, %v1030_v41 }
  0xa7   : > { %4178 = vmatpush1.msk.msra.mxu0 %vm329_vm2, %v1029_v43  ;;  %4167 = vmatmul.mubr.msk.f32.vlgmr.msra.gmra.mrb[8].mxu1 %vm325_vm3, %v4164_v40 }
  0xa8   : > { %4179 = vmatmul.mubr.msk.f32.vlgmr.msra.gmra.mrb[2].mxu0 %vm325_vm3, %v4176_v42  ;;  %v1200_v45 = vpop.permute.xlu0 %1199  ;;  %4333 = vmatpush3.msk.msra.mxu1 %vm329_vm2, %v677_v26 }
  0xa9   : > { %4334 = vmatprep.mubr.msk.f32.mxu1 %vm4599_vm4, %v4589_v0  ;;  %v1204_v46 = vsel %vm322_vm1, %v1200_v45, %v1202_v44  ;;  %4337 = vmatprep.subr.mxu1 %v4589_v0  ;;  %v1374_v47 = vpop.permute.xlu1 %1373 }
  0xaa   : > { %4183 = vmatprep.subr.msk.mxu0 %vm329_vm2, %v1204_v46  ;;  %1278 = vmatprep.mubr.f32.mxu0 %v4589_v0 }
  0xab   : > { %4335 = vmatmul.mubr.msk.f32.vlgmr.msra.gmra.mrb[10].mxu1 %vm325_vm3, %v4164_v40 }
  0xac   : > { %v1198_v48 = vpop.permute.xlu0 %1197  ;;  %4338 = vmatpush3.msk.msra.mxu1 %vm329_vm2, %v852_v27  ;;  %4339 = vmatprep.mubr.msk.f32.mxu1 %vm4599_vm4, %v4589_v0 }
  0xad   : > { %v1203_v50 = vsel %vm322_vm1, %v1198_v48, %v1200_v45  ;;  %4342 = vmatprep.subr.mxu1 %v4589_v0  ;;  %v1372_v51 = vpop.permute.xlu1 %1371 }
  0xae   : > { %4184 = vmatpush1.msk.msra.mxu0 %vm329_vm2, %v1203_v50  ;;  %v1378_v55 = vsel %vm1377_vm8, %v1372_v51, %v1374_v47 }
  0xaf   : > { %4185 = vmatmul.mubr.msk.f32.vlgmr.msra.gmra.mrb[4].mxu0 %vm325_vm3, %v4182_v49  ;;  %4340 = vmatmul.mubr.msk.f32.vlgmr.msra.gmra.mrb[12].mxu1 %vm325_vm3, %v4170_v34 }
  0xb0   : > { %v1376_v52 = vpop.permute.xlu0 %1375  ;;  %1453 = vmatprep.mubr.f32.mxu0 %v4589_v0  ;;  %4343 = vmatpush3.msk.msra.mxu1 %vm329_vm2, %v1027_v39 }
  0xb1   : > { %4344 = vmatprep.mubr.msk.f32.mxu1 %vm4599_vm4, %v4589_v0  ;;  %v1379_v53 = vsel %vm1377_vm8, %v1374_v47, %v1376_v52  ;;  %4347 = vmatprep.subr.mxu1 %v4589_v0  ;;  %v1551_v56 = vpop.permute.xlu1 %1550 }
  0xb2   : > { %4189 = vmatprep.subr.msk.mxu0 %vm329_vm2, %v1379_v53 }
  0xb3   : > { %4190 = vmatpush1.msk.msra.mxu0 %vm329_vm2, %v1378_v55  ;;  %4345 = vmatmul.mubr.msk.f32.vlgmr.msra.gmra.mrb[14].mxu1 %vm325_vm3, %v4176_v42 }
  0xb4   : > { %4191 = vmatmul.mubr.msk.f32.vlgmr.msra.gmra.mrb[6].mxu0 %vm325_vm3, %v4188_v54  ;;  %v1549_v57 = vpop.permute.xlu0 %1548  ;;  %4348 = vmatpush3.msk.msra.mxu1 %vm329_vm2, %v1202_v44 }
  0xb5   : > { %4349 = vmatprep.mubr.msk.f32.mxu1 %vm4599_vm4, %v4589_v0  ;;  %v1554_v58 = vsel %vm1552_vm9, %v1549_v57, %v1551_v56  ;;  %4352 = vmatprep.subr.mxu1 %v4589_v0  ;;  %v1724_v59 = vpop.permute.xlu1 %1723 }
  0xb6   : > { %4195 = vmatprep.subr.msk.mxu0 %vm329_vm2, %v1554_v58  ;;  %1628 = vmatprep.mubr.f32.mxu0 %v4589_v0 }
  0xb7   : > { %4350 = vmatmul.mubr.msk.f32.vlgmr.msra.gmra.mrb[16].mxu1 %vm325_vm3, %v4182_v49 }
  0xb8   : > { %v1547_v60 = vpop.permute.xlu0 %1546  ;;  %4353 = vmatpush3.msk.msra.mxu1 %vm329_vm2, %v1376_v52  ;;  %4354 = vmatprep.mubr.msk.f32.mxu1 %vm4599_vm4, %v4589_v0 }
  0xb9   : > { %v1553_v62 = vsel %vm1552_vm9, %v1547_v60, %v1549_v57  ;;  %4357 = vmatprep.subr.mxu1 %v4589_v0  ;;  %v1722_v63 = vpop.permute.xlu1 %1721 }
  0xba   : > { %4196 = vmatpush1.msk.msra.mxu0 %vm329_vm2, %v1553_v62  ;;  %v1728_v4 = vsel %vm1727_vm10, %v1722_v63, %v1724_v59 }
  0xbb   : > { %4197 = vmatmul.mubr.msk.f32.vlgmr.msra.gmra.mrb[8].mxu0 %vm325_vm3, %v4194_v61  ;;  %4355 = vmatmul.mubr.msk.f32.vlgmr.msra.gmra.mrb[18].mxu1 %vm325_vm3, %v4188_v54 }
  0xbc   : > { %v1726_v1 = vpop.permute.xlu0 %1725  ;;  %1803 = vmatprep.mubr.f32.mxu0 %v4589_v0  ;;  %4358 = vmatpush3.msk.msra.mxu1 %vm329_vm2, %v1551_v56 }
  0xbd   : > { %v1729_v2 = vsel %vm1727_vm10, %v1724_v59, %v1726_v1  ;;  %4359 = vmatprep.mubr.msk.f32.mxu1 %vm4599_vm4, %v4589_v0  ;;  %4362 = vmatprep.subr.mxu1 %v4589_v0  ;;  %v1901_v5 = vpop.permute.xlu1 %1900 }
  0xbe   : > { %4201 = vmatprep.subr.msk.mxu0 %vm329_vm2, %v1729_v2 }
  0xbf   : > { %4202 = vmatpush1.msk.msra.mxu0 %vm329_vm2, %v1728_v4  ;;  %4360 = vmatmul.mubr.msk.f32.vlgmr.msra.gmra.mrb[20].mxu1 %vm325_vm3, %v4194_v61 }
  0xc0   : > { %4203 = vmatmul.mubr.msk.f32.vlgmr.msra.gmra.mrb[10].mxu0 %vm325_vm3, %v4200_v3  ;;  %v1899_v6 = vpop.permute.xlu0 %1898  ;;  %4363 = vmatpush3.msk.msra.mxu1 %vm329_vm2, %v1726_v1 }
  0xc1   : > { %v1904_v7 = vsel %vm1902_vm11, %v1899_v6, %v1901_v5  ;;  %4364 = vmatprep.mubr.msk.f32.mxu1 %vm4599_vm4, %v4589_v0  ;;  %4367 = vmatprep.subr.mxu1 %v4589_v0 }
  0xc2   : > { %4207 = vmatprep.subr.msk.mxu0 %vm329_vm2, %v1904_v7  ;;  %1978 = vmatprep.mubr.f32.mxu0 %v4589_v0 }
  0xc3   : > { %4365 = vmatmul.mubr.msk.f32.vlgmr.msra.gmra.mrb[22].mxu1 %vm325_vm3, %v4200_v3 }
  0xc4   : > { %v1897_v8 = vpop.permute.xlu0 %1896  ;;  %4368 = vmatpush3.msk.msra.mxu1 %vm329_vm2, %v1901_v5  ;;  %4369 = vmatprep.mubr.msk.f32.mxu1 %vm4599_vm4, %v4589_v0 }
  0xc5   : > { %v1903_v10 = vsel %vm1902_vm11, %v1897_v8, %v1899_v6  ;;  %4372 = vmatprep.subr.mxu1 %v4589_v0 }
  0xc6   : > { %4208 = vmatpush1.msk.msra.mxu0 %vm329_vm2, %v1903_v10  ;;  %vm2106_vm2 = vcmask 7168  }
  0xc7   : > { %4209 = vmatmul.mubr.msk.f32.vlgmr.msra.gmra.mrb[12].mxu0 %vm325_vm3, %v4206_v9  ;;  %4370 = vmatmul.mubr.msk.f32.vlgmr.msra.gmra.mrb[24].mxu1 %vm325_vm3, %v4206_v9  ;;  %vm2218_vm3 = vcmask 138368  }
  0xc8   : > { %2428 = vmatprep.mubr.f32.mxu0 %v4589_v0  ;;  %4374 = vmatprep.mubr.msk.f32.mxu1 %vm4599_vm4, %v4589_v0 }
  0xce   : > { %v504_v17 = vpop.permute.xlu1 %503 }
 0x16a   : > { %v4917_v11 = vpop.f32.mrb[0].mxu1 }
 0x16b   : > { %v4919_v12 = vpop.f32.mrb[1].mxu1 }
 0x16e   : > { %v4921_v13 = vpop.f32.mrb[2].mxu1 }
 0x16f   : > { %v4326_v14 = vpop.f32.mrb[3].mxu1 }
 0x172   : > { %v584_v15 = vpop.f32.mrb[4].mxu1 }
 0x173   : > { %v586_v16 = vpop.f32.mrb[5].mxu1  ;;  %v585_v21 = vadd.f32 %v584_v15, %v504_v17 }
 0x174   : > { %v587_v24 = vadd.f32 %v586_v16, %v504_v17 }
 0x176   : > { %v931_v18 = vpop.f32.mrb[0].mxu0  ;;  %v655_v19 = vpop.f32.mrb[6].mxu1 }
 0x177   : > { %v933_v20 = vpop.f32.mrb[1].mxu0  ;;  %v656_v22 = vadd.f32 %v655_v19, %v504_v17  ;;  %v4331_v23 = vpop.f32.mrb[7].mxu1 }
 0x179   : > { %661 = vst.msk [vmem:[#allocation3 + $0x10] sm:$0xff] %vm488_vm12, %v656_v22 }
 0x17a   : > { %v756_v25 = vpop.f32.mrb[8].mxu1 }
 0x17b   : > { %v1106_v26 = vpop.f32.mrb[2].mxu0  ;;  %v831_v27 = vadd.f32 %v756_v25, %v585_v21  ;;  %v758_v28 = vpop.f32.mrb[9].mxu1 }
 0x17c   : > { %v1108_v29 = vpop.f32.mrb[3].mxu0  ;;  %v832_v30 = vadd.f32 %v758_v28, %v587_v24 }
 0x17d   : > { %v1006_v31 = vadd.f32 %v931_v18, %v831_v27 }
 0x17e   : > { %v827_v32 = vpop.f32.mrb[10].mxu1  ;;  %v1007_v33 = vadd.f32 %v933_v20, %v832_v30 }
 0x17f   : > { %v4336_v34 = vpop.f32.mrb[11].mxu1  ;;  %v1181_v35 = vadd.f32 %v1106_v26, %v1006_v31 }
 0x180   : > { %v664_v36 = vld [vmem:[#allocation3 + $0x10] sm:$0xff]  ;;  %v1182_v37 = vadd.f32 %v1108_v29, %v1007_v33 }
 0x181   : > { %v833_v38 = vadd.f32 %v827_v32, %v664_v36 }
 0x182   : > { %v1280_v39 = vpop.f32.mrb[4].mxu0  ;;  %v1002_v40 = vpop.f32.mrb[12].mxu1 }
 0x183   : > { %v1355_v41 = vadd.f32 %v1280_v39, %v1181_v35  ;;  %v1282_v42 = vpop.f32.mrb[5].mxu0  ;;  %836 = vst.msk [vmem:[#allocation3 + $0x10] sm:$0xff] %vm488_vm12, %v833_v38  ;;  %v4341_v43 = vpop.f32.mrb[13].mxu1 }
 0x184   : > { %v1356_v44 = vadd.f32 %v1282_v42, %v1182_v37 }
 0x186   : > { %v1177_v45 = vpop.f32.mrb[14].mxu1 }
 0x187   : > { %v1455_v46 = vpop.f32.mrb[6].mxu0  ;;  %v4346_v47 = vpop.f32.mrb[15].mxu1 }
 0x188   : > { %v1530_v48 = vadd.f32 %v1455_v46, %v1355_v41  ;;  %v1457_v49 = vpop.f32.mrb[7].mxu0 }
 0x189   : > { %v1531_v50 = vadd.f32 %v1457_v49, %v1356_v44 }
 0x18a   : > { %v839_v51 = vld [vmem:[#allocation3 + $0x10] sm:$0xff]  ;;  %v1351_v52 = vpop.f32.mrb[16].mxu1 }
 0x18b   : > { %v1008_v53 = vadd.f32 %v1002_v40, %v839_v51  ;;  %v4351_v54 = vpop.f32.mrb[17].mxu1 }
 0x18d   : > { %1011 = vst.msk [vmem:[#allocation3 + $0x10] sm:$0xff] %vm488_vm12, %v1008_v53 }
 0x18e   : > { %v1630_v55 = vpop.f32.mrb[8].mxu0  ;;  %v1526_v56 = vpop.f32.mrb[18].mxu1 }
 0x18f   : > { %v1705_v57 = vadd.f32 %v1630_v55, %v1530_v48  ;;  %v1632_v58 = vpop.f32.mrb[9].mxu0  ;;  %v4356_v60 = vpop.f32.mrb[19].mxu1 }
 0x190   : > { %v1706_v59 = vadd.f32 %v1632_v58, %v1531_v50 }
 0x192   : > { %v1701_v61 = vpop.f32.mrb[20].mxu1 }
 0x193   : > { %v1805_v62 = vpop.f32.mrb[10].mxu0  ;;  %v4361_v2 = vpop.f32.mrb[21].mxu1 }
 0x194   : > { %v1880_v63 = vadd.f32 %v1805_v62, %v1705_v57  ;;  %v1807_v1 = vpop.f32.mrb[11].mxu0  ;;  %v1014_v3 = vld [vmem:[#allocation3 + $0x10] sm:$0xff] }
 0x195   : > { %v1881_v4 = vadd.f32 %v1807_v1, %v1706_v59  ;;  %v1183_v5 = vadd.f32 %v1177_v45, %v1014_v3 }
 0x196   : > { %v1876_v6 = vpop.f32.mrb[22].mxu1 }
 0x197   : > { %1186 = vst.msk [vmem:[#allocation3 + $0x10] sm:$0xff] %vm488_vm12, %v1183_v5  ;;  %v4366_v7 = vpop.f32.mrb[23].mxu1 }
 0x19a   : > { %v1980_v8 = vpop.f32.mrb[12].mxu0  ;;  %v2051_v14 = vpop.f32.mrb[24].mxu1 }
 0x19b   : > { %v2055_v9 = vadd.f32 %v1980_v8, %v1880_v63  ;;  %v1982_v10 = vpop.f32.mrb[13].mxu0  ;;  %v4371_v16 = vpop.f32.mrb[25].mxu1 }
 0x19c   : > { %v2056_v15 = vadd.f32 %v1982_v10, %v1881_v4 }
 0x19d   : > { %v2064_v17 = vmax.f32 %v2055_v9, 0.0 }
 0x19e   : > { %v2065_v18 = vmax.f32 %v2056_v15, 0.0  ;;  %v1189_v19 = vld [vmem:[#allocation3 + $0x10] sm:$0xff] }
 0x19f   : > { %2070 = vrot.lane.b32.xlu0 %v2064_v17, %s4600_s20  ;;  %v1357_v20 = vadd.f32 %v1351_v52, %v1189_v19 }
 0x1a0   : > { %2072 = vrot.lane.b32.xlu1 %v2065_v18, %s4600_s20 }
 0x1a1   : > { %1360 = vst.msk [vmem:[#allocation3 + $0x10] sm:$0xff] %vm488_vm12, %v1357_v20 }
 0x1a8   : > { %v1363_v21 = vld [vmem:[#allocation3 + $0x10] sm:$0xff] }
 0x1a9   : > { %v1532_v22 = vadd.f32 %v1526_v56, %v1363_v21 }
 0x1ab   : > { %1535 = vst.msk [vmem:[#allocation3 + $0x10] sm:$0xff] %vm488_vm12, %v1532_v22 }
 0x1b2   : > { %v1538_v23 = vld [vmem:[#allocation3 + $0x10] sm:$0xff] }
 0x1b3   : > { %v1707_v24 = vadd.f32 %v1701_v61, %v1538_v23 }
 0x1b5   : > { %1710 = vst.msk [vmem:[#allocation3 + $0x10] sm:$0xff] %vm488_vm12, %v1707_v24 }
 0x1bc   : > { %v1713_v25 = vld [vmem:[#allocation3 + $0x10] sm:$0xff] }
 0x1bd   : > { %v1882_v26 = vadd.f32 %v1876_v6, %v1713_v25 }
 0x1bf   : > { %1885 = vst.msk [vmem:[#allocation3 + $0x10] sm:$0xff] %vm488_vm12, %v1882_v26 }
 0x1c6   : > { %v1888_v27 = vld [vmem:[#allocation3 + $0x10] sm:$0xff] }
 0x1c7   : > { %v2057_v28 = vadd.f32 %v2051_v14, %v1888_v27 }
 0x1c9   : > { %2060 = vst.msk [vmem:[#allocation3 + $0x10] sm:$0xff] %vm488_vm12, %v2057_v28 }
 0x1d0   : > { %v2063_v52 = vld [vmem:[#allocation3 + $0x10] sm:$0xff] }
 0x1d1   : > { %v2066_v53 = vmax.f32 %v2063_v52, 0.0 }
 0x211   : > { %v2071_v29 = vpop.permute.xlu0 %2070 }
 0x212   : > { %2083 = vst.msk [vmem:[#allocation2] sm:$0xff] %vm2082_vm13, %v2071_v29  ;;  %v4934_v30 = vpop.permute.xlu1 %2072  ;;  %vm2113_vm13 = vcmask 146568  }
 0x213   : > { %v4938_v31 = vsel %vm2076_vm14, %v2071_v29, %v4934_v30 }
 0x214   : > { %2084 = vst [vmem:[#allocation2 + $0x8] sm:$0xff] %v4938_v31 }
 0x219   : > { %v2087_v32 = vld [vmem:[#allocation2] sm:$0xff] }
 0x21a   : > { %2089 = vrot.lane.b32.xlu0 %v2087_v32, %s4595_s10 }
 0x21e   : > { %2208 = vrot.lane.b32.xlu0 %v4938_v31, %s4601_s21 }
 0x28c   : > { %v2090_v33 = vpop.permute.xlu0 %2089 }
 0x28d   : > { %2093 = vst.msk [vmem:[#allocation2] sm:$0xff] %vm2092_vm15, %v2090_v33  ;;  %vm2225_vm15 = vcmask 277768  }
 0x290   : > { %v2209_v34 = vpop.permute.xlu0 %2208 }
 0x291   : > { %2212 = vst.msk [vmem:[#allocation2 + $0x8] sm:$0xff] %vm2211_vm0, %v2209_v34  ;;  %vm2120_vm0 = vcmask 154768  }
 0x294   : > { %v2101_v35 = vld [vmem:[#allocation2] sm:$0xff] }
 0x295   : > { %2103 = vrot.lane.b32.xlu1 %v2101_v35, %s4592_s24 }
 0x298   : > { %v2213_v36 = vld [vmem:[#allocation2 + $0x8] sm:$0xff] }
 0x299   : > { %2215 = vrot.lane.b32.xlu0 %v2213_v36, %s4592_s24 }
 0x307   : > { %v2104_v37 = vpop.permute.xlu1 %2103 }
 0x308   : > { %2107 = vst.msk [vmem:[#allocation2] sm:$0xff] %vm2106_vm2, %v2104_v37  ;;  %vm2232_vm2 = vcmask 285968  }
 0x30b   : > { %v2216_v38 = vpop.permute.xlu0 %2215 }
 0x30c   : > { %2219 = vst.msk [vmem:[#allocation2 + $0x8] sm:$0xff] %vm2218_vm3, %v2216_v38  ;;  %vm2127_vm3 = vcmask 294168  }
 0x30f   : > { %v2108_v39 = vld [vmem:[#allocation2] sm:$0xff] }
 0x310   : > { %2110 = vrot.lane.b32.xlu1 %v2108_v39, %s4601_s21 }
 0x313   : > { %v2220_v40 = vld [vmem:[#allocation2 + $0x8] sm:$0xff] }
 0x314   : > { %2222 = vrot.lane.b32.xlu0 %v2220_v40, %s4601_s21 }
 0x382   : > { %v2111_v41 = vpop.permute.xlu1 %2110 }
 0x383   : > { %2114 = vst.msk [vmem:[#allocation2] sm:$0xff] %vm2113_vm13, %v2111_v41  ;;  %vm2239_vm13 = vcmask 425368  }
 0x386   : > { %v2223_v42 = vpop.permute.xlu0 %2222 }
 0x387   : > { %2226 = vst.msk [vmem:[#allocation2 + $0x8] sm:$0xff] %vm2225_vm15, %v2223_v42  ;;  %vm2134_vm15 = vcmask 302368  }
 0x38a   : > { %v2115_v43 = vld [vmem:[#allocation2] sm:$0xff] }
 0x38b   : > { %2117 = vrot.lane.b32.xlu1 %v2115_v43, %s4592_s24 }
 0x38e   : > { %v2227_v44 = vld [vmem:[#allocation2 + $0x8] sm:$0xff] }
 0x38f   : > { %2229 = vrot.lane.b32.xlu0 %v2227_v44, %s4592_s24 }
 0x3fd   : > { %v2118_v45 = vpop.permute.xlu1 %2117 }
 0x3fe   : > { %2121 = vst.msk [vmem:[#allocation2] sm:$0xff] %vm2120_vm0, %v2118_v45  ;;  %vm2085_vm0 = vcmask 400384  }
 0x401   : > { %v2230_v46 = vpop.permute.xlu0 %2229 }
 0x402   : > { %2233 = vst.msk [vmem:[#allocation2 + $0x8] sm:$0xff] %vm2232_vm2, %v2230_v46  ;;  %vm2246_vm2 = vcmask 433568  }
 0x405   : > { %v2122_v47 = vld [vmem:[#allocation2] sm:$0xff] }
 0x406   : > { %2124 = vrot.lane.b32.xlu1 %v2122_v47, %s4601_s21 }
 0x409   : > { %v2234_v48 = vld [vmem:[#allocation2 + $0x8] sm:$0xff] }
 0x40a   : > { %2236 = vrot.lane.b32.xlu0 %v2234_v48, %s4601_s21 }
 0x478   : > { %v2125_v49 = vpop.permute.xlu1 %2124 }
 0x479   : > { %2128 = vst.msk [vmem:[#allocation2] sm:$0xff] %vm2127_vm3, %v2125_v49  ;;  %vm2141_vm3 = vcmask 441768  }
 0x47c   : > { %v2237_v50 = vpop.permute.xlu0 %2236 }
 0x47d   : > { %2240 = vst.msk [vmem:[#allocation2 + $0x8] sm:$0xff] %vm2239_vm13, %v2237_v50  ;;  %vm2099_vm13 = vcmask 548248  }
 0x480   : > { %v2129_v51 = vld [vmem:[#allocation2] sm:$0xff] }
 0x481   : > { %2131 = vrot.lane.b32.xlu1 %v2129_v51, %s4592_s24  ;;  %v2356_v51 = vld [vmem:[%s5286_s3] sm:$0xff] }
 0x484   : > { %v2241_v54 = vld [vmem:[#allocation2 + $0x8] sm:$0xff] }
 0x485   : > { %2074 = vrot.lane.b32.xlu1 %v2066_v53, %s4600_s20 }
 0x489   : > { %2243 = vrot.lane.b32.xlu1 %v2241_v54, %s4592_s24  ;;  %v307_v54 = vld [vmem:[%s5289_s6] sm:$0xff] }
 0x4f3   : > { %v2132_v55 = vpop.permute.xlu1 %2131 }
 0x4f4   : > { %2135 = vst.msk [vmem:[#allocation2] sm:$0xff] %vm2134_vm15, %v2132_v55  ;;  %vm2148_vm15 = vcmask 449968   ;;  %v477_v55 = vld [vmem:[%s5287_s4] sm:$0xff] }
 0x4f7   : > { %v2075_v56 = vpop.permute.xlu1 %2074 }
 0x4f8   : > { %v2078_v57 = vsel %vm2076_vm14, %v4934_v30, %v2075_v56  ;;  %vm2253_vm14 = vcmask 572968  }
 0x4f9   : > { %2086 = vst.msk [vmem:[#allocation2 + $0x10] sm:$0xff] %vm2085_vm0, %v2078_v57  ;;  %vm2260_vm0 = vcmask 581168  }
 0x4fb   : > { %v2244_v58 = vpop.permute.xlu1 %2243  ;;  %v2136_v59 = vld [vmem:[#allocation2] sm:$0xff] }
 0x4fc   : > { %2247 = vst.msk [vmem:[#allocation2 + $0x8] sm:$0xff] %vm2246_vm2, %v2244_v58  ;;  %2138 = vrot.lane.b32.xlu0 %v2136_v59, %s4601_s21  ;;  %vm2155_vm2 = vcmask 589368   ;;  %v4214_v58 = vld [vmem:[%s5286_s3 + $0x8] sm:$0xff] }
 0x500   : > { %v2094_v60 = vld [vmem:[#allocation2 + $0x10] sm:$0xff] }
 0x501   : > { %2096 = vrot.lane.b32.xlu0 %v2094_v60, %s4602_s17 }
 0x503   : > { %v2248_v61 = vld [vmem:[#allocation2 + $0x8] sm:$0xff] }
 0x505   : > { %2250 = vrot.lane.b32.xlu0 %v2248_v61, %s4601_s21 }
 0x56e   : > { %v2139_v62 = vpop.permute.xlu0 %2138 }
 0x56f   : > { %2142 = vst.msk [vmem:[#allocation2] sm:$0xff] %vm2141_vm3, %v2139_v62  ;;  %vm2309_vm3 = vcmask 113768  }
 0x573   : > { %v2097_v63 = vpop.permute.xlu0 %2096 }
 0x574   : > { %2100 = vst.msk [vmem:[#allocation2 + $0x10] sm:$0xff] %vm2099_vm13, %v2097_v63  ;;  %vm2267_vm13 = vcmask 720568   ;;  %v4217_v63 = vld [vmem:[%s5286_s3 + $0x10] sm:$0xff] }
 0x576   : > { %v2143_v1 = vld [vmem:[#allocation2] sm:$0xff] }
 0x577   : > { %2145 = vrot.lane.b32.xlu1 %v2143_v1, %s4592_s24  ;;  %v2251_v2 = vpop.permute.xlu0 %2250 }
 0x578   : > { %2254 = vst.msk [vmem:[#allocation2 + $0x8] sm:$0xff] %vm2253_vm14, %v2251_v2  ;;  %vm2162_vm14 = vcmask 597568  }
 0x57b   : > { %v2304_v7 = vld [vmem:[#allocation2 + $0x10] sm:$0xff] }
 0x57f   : > { %v2255_v3 = vld [vmem:[#allocation2 + $0x8] sm:$0xff] }
 0x580   : > { %2257 = vrot.lane.b32.xlu0 %v2255_v3, %s4592_s24 }
 0x5e9   : > { %v2146_v4 = vpop.permute.xlu1 %2145 }
 0x5ea   : > { %2149 = vst.msk [vmem:[#allocation2] sm:$0xff] %vm2148_vm15, %v2146_v4  ;;  %vm2316_vm15 = vcmask 121968  }
 0x5f1   : > { %v2150_v5 = vld [vmem:[#allocation2] sm:$0xff] }
 0x5f2   : > { %v2258_v6 = vpop.permute.xlu0 %2257  ;;  %2152 = vrot.lane.b32.xlu1 %v2150_v5, %s4601_s21 }
 0x5f3   : > { %2261 = vst.msk [vmem:[#allocation2 + $0x8] sm:$0xff] %vm2260_vm0, %v2258_v6  ;;  %vm2274_vm0 = vcmask 728768  }
 0x5f6   : > { %2306 = vrot.lane.b32.xlu1 %v2304_v7, %s4601_s21 }
 0x5fa   : > { %v2262_v8 = vld [vmem:[#allocation2 + $0x8] sm:$0xff] }
 0x5fb   : > { %2264 = vrot.lane.b32.xlu1 %v2262_v8, %s4601_s21  ;;  %v4220_v8 = vld [vmem:[%s5286_s3 + $0x18] sm:$0xff] }
 0x664   : > { %v2153_v9 = vpop.permute.xlu1 %2152 }
 0x665   : > { %2156 = vst.msk [vmem:[#allocation2] sm:$0xff] %vm2155_vm2, %v2153_v9  ;;  %vm2169_vm2 = vcmask 736968  }
 0x668   : > { %v2307_v10 = vpop.permute.xlu1 %2306 }
 0x669   : > { %2310 = vst.msk [vmem:[#allocation2 + $0x10] sm:$0xff] %vm2309_vm3, %v2307_v10  ;;  %vm2323_vm3 = vcmask 261368  }
 0x66c   : > { %v2157_v14 = vld [vmem:[#allocation2] sm:$0xff] }
 0x66d   : > { %2159 = vrot.lane.b32.xlu0 %v2157_v14, %s4592_s24  ;;  %v2265_v15 = vpop.permute.xlu1 %2264 }
 0x66e   : > { %2268 = vst.msk [vmem:[#allocation2 + $0x8] sm:$0xff] %vm2267_vm13, %v2265_v15  ;;  %vm2281_vm13 = vcmask 868168  }
 0x670   : > { %v2311_v16 = vld [vmem:[#allocation2 + $0x10] sm:$0xff] }
 0x671   : > { %2313 = vrot.lane.b32.xlu0 %v2311_v16, %s4592_s24  ;;  %v4223_v16 = vld [vmem:[%s5286_s3 + $0x20] sm:$0xff] }
 0x675   : > { %v2269_v17 = vld [vmem:[#allocation2 + $0x8] sm:$0xff] }
 0x676   : > { %2271 = vrot.lane.b32.xlu0 %v2269_v17, %s4592_s24 }
 0x6df   : > { %v2160_v18 = vpop.permute.xlu0 %2159 }
 0x6e0   : > { %2163 = vst.msk [vmem:[#allocation2] sm:$0xff] %vm2162_vm14, %v2160_v18  ;;  %vm2176_vm14 = vcmask 745168  }
 0x6e3   : > { %v2314_v19 = vpop.permute.xlu0 %2313 }
 0x6e4   : > { %2317 = vst.msk [vmem:[#allocation2 + $0x10] sm:$0xff] %vm2316_vm15, %v2314_v19  ;;  %vm2330_vm15 = vcmask 269568  }
 0x6e7   : > { %v2164_v20 = vld [vmem:[#allocation2] sm:$0xff] }
 0x6e8   : > { %2166 = vrot.lane.b32.xlu1 %v2164_v20, %s4601_s21  ;;  %v2272_v21 = vpop.permute.xlu0 %2271 }
 0x6e9   : > { %2275 = vst.msk [vmem:[#allocation2 + $0x8] sm:$0xff] %vm2274_vm0, %v2272_v21  ;;  %vm2288_vm0 = vcmask 876368  }
 0x6eb   : > { %v2318_v22 = vld [vmem:[#allocation2 + $0x10] sm:$0xff] }
 0x6ec   : > { %2320 = vrot.lane.b32.xlu1 %v2318_v22, %s4601_s21 }
 0x6f0   : > { %v2276_v23 = vld [vmem:[#allocation2 + $0x8] sm:$0xff] }
 0x6f1   : > { %2278 = vrot.lane.b32.xlu1 %v2276_v23, %s4601_s21  ;;  %v4226_v23 = vld [vmem:[%s5286_s3 + $0x28] sm:$0xff] }
 0x75a   : > { %v2167_v24 = vpop.permute.xlu1 %2166 }
 0x75b   : > { %2170 = vst.msk [vmem:[#allocation2] sm:$0xff] %vm2169_vm2, %v2167_v24  ;;  %vm2183_vm2 = vcmask 884568  }
 0x75e   : > { %v2321_v25 = vpop.permute.xlu1 %2320 }
 0x75f   : > { %2324 = vst.msk [vmem:[#allocation2 + $0x10] sm:$0xff] %vm2323_vm3, %v2321_v25  ;;  %vm2337_vm3 = vcmask 408968  }
 0x762   : > { %v2171_v26 = vld [vmem:[#allocation2] sm:$0xff] }
 0x763   : > { %2173 = vrot.lane.b32.xlu0 %v2171_v26, %s4592_s24  ;;  %v2279_v27 = vpop.permute.xlu1 %2278 }
 0x764   : > { %2282 = vst.msk [vmem:[#allocation2 + $0x8] sm:$0xff] %vm2281_vm13, %v2279_v27  ;;  %vm2295_vm13 = vcmask 1015768  }
 0x766   : > { %v2325_v28 = vld [vmem:[#allocation2 + $0x10] sm:$0xff] }
 0x767   : > { %2327 = vrot.lane.b32.xlu0 %v2325_v28, %s4592_s24  ;;  %v4229_v28 = vld [vmem:[%s5286_s3 + $0x30] sm:$0xff] }
 0x76b   : > { %v2283_v29 = vld [vmem:[#allocation2 + $0x8] sm:$0xff] }
 0x76c   : > { %2285 = vrot.lane.b32.xlu0 %v2283_v29, %s4592_s24 }
 0x7d5   : > { %v2174_v30 = vpop.permute.xlu0 %2173 }
 0x7d6   : > { %2177 = vst.msk [vmem:[#allocation2] sm:$0xff] %vm2176_vm14, %v2174_v30  ;;  %vm2190_vm14 = vcmask 892768  }
 0x7d9   : > { %v2328_v32 = vpop.permute.xlu0 %2327 }
 0x7da   : > { %2331 = vst.msk [vmem:[#allocation2 + $0x10] sm:$0xff] %vm2330_vm15, %v2328_v32  ;;  %vm2344_vm15 = vcmask 417168  }
 0x7dd   : > { %v2178_v33 = vld [vmem:[#allocation2] sm:$0xff] }
 0x7de   : > { %2180 = vrot.lane.b32.xlu1 %v2178_v33, %s4601_s21  ;;  %v2286_v34 = vpop.permute.xlu0 %2285 }
 0x7df   : > { %2289 = vst.msk [vmem:[#allocation2 + $0x8] sm:$0xff] %vm2288_vm0, %v2286_v34  ;;  %vm2302_vm0 = vcmask 1023968  }
 0x7e1   : > { %v2332_v35 = vld [vmem:[#allocation2 + $0x10] sm:$0xff] }
 0x7e2   : > { %2334 = vrot.lane.b32.xlu1 %v2332_v35, %s4601_s21 }
 0x7e6   : > { %v2290_v36 = vld [vmem:[#allocation2 + $0x8] sm:$0xff] }
 0x7e7   : > { %2292 = vrot.lane.b32.xlu1 %v2290_v36, %s4601_s21  ;;  %v4232_v36 = vld [vmem:[%s5286_s3 + $0x38] sm:$0xff] }
 0x850   : > { %v2181_v37 = vpop.permute.xlu1 %2180 }
 0x851   : > { %2184 = vst.msk [vmem:[#allocation2] sm:$0xff] %vm2183_vm2, %v2181_v37  ;;  %vm2197_vm2 = vcmask 1032168  }
 0x854   : > { %v2335_v38 = vpop.permute.xlu1 %2334 }
 0x855   : > { %2338 = vst.msk [vmem:[#allocation2 + $0x10] sm:$0xff] %vm2337_vm3, %v2335_v38  ;;  %vm2204_vm3 = vcmask 1040368  }
 0x858   : > { %v2185_v39 = vld [vmem:[#allocation2] sm:$0xff] }
 0x859   : > { %2187 = vrot.lane.b32.xlu0 %v2185_v39, %s4592_s24  ;;  %v2293_v40 = vpop.permute.xlu1 %2292 }
 0x85a   : > { %2296 = vst.msk [vmem:[#allocation2 + $0x8] sm:$0xff] %vm2295_vm13, %v2293_v40  ;;  %vm2351_vm13 = vcmask 556568  }
 0x85c   : > { %v2339_v41 = vld [vmem:[#allocation2 + $0x10] sm:$0xff] }
 0x85d   : > { %2341 = vrot.lane.b32.xlu0 %v2339_v41, %s4592_s24 }
 0x861   : > { %v2297_v42 = vld [vmem:[#allocation2 + $0x8] sm:$0xff] }
 0x862   : > { %2299 = vrot.lane.b32.xlu0 %v2297_v42, %s4592_s24  ;;  %v4235_v42 = vld [vmem:[%s5286_s3 + $0x40] sm:$0xff] }
 0x866   : > { %2201 = vrot.lane.b32.xlu0 %v4938_v31, %s4592_s24 }
 0x8cb   : > { %v2188_v43 = vpop.permute.xlu0 %2187 }
 0x8cc   : > { %2191 = vst.msk [vmem:[#allocation2] sm:$0xff] %vm2190_vm14, %v2188_v43  ;;  %vm2360_vm14 = vcmask 64512  }
 0x8cf   : > { %v2342_v44 = vpop.permute.xlu0 %2341 }
 0x8d0   : > { %2345 = vst.msk [vmem:[#allocation2 + $0x10] sm:$0xff] %vm2344_vm15, %v2342_v44 }
 0x8d3   : > { %v2192_v45 = vld [vmem:[#allocation2] sm:$0xff] }
 0x8d4   : > { %2194 = vrot.lane.b32.xlu1 %v2192_v45, %s4601_s21  ;;  %v2300_v46 = vpop.permute.xlu0 %2299 }
 0x8d5   : > { %2303 = vst.msk [vmem:[#allocation2 + $0x8] sm:$0xff] %vm2302_vm0, %v2300_v46 }
 0x8d7   : > { %v2346_v47 = vld [vmem:[#allocation2 + $0x10] sm:$0xff] }
 0x8d8   : > { %2348 = vrot.lane.b32.xlu1 %v2346_v47, %s4601_s21  ;;  %v2202_v49 = vpop.permute.xlu0 %2201 }
 0x8dc   : > { %v2517_v48 = vld [vmem:[#allocation2 + $0x8] sm:$0xff] }
 0x8dd   : > { %2524 = vrot.lane.b32.xlu1 %v2517_v48, %s4591_s23  ;;  %2364 = vmatprep.subr.mxu0 %v2517_v48 }
 0x946   : > { %v2195_v31 = vpop.permute.xlu1 %2194 }
 0x947   : > { %2198 = vst.msk [vmem:[#allocation2] sm:$0xff] %vm2197_vm2, %v2195_v31 }
 0x948   : > { %2205 = vst.msk [vmem:[#allocation2] sm:$0xff] %vm2204_vm3, %v2202_v49 }
 0x94a   : > { %v2349_v50 = vpop.permute.xlu1 %2348 }
 0x94b   : > { %2352 = vst.msk [vmem:[#allocation2 + $0x10] sm:$0xff] %vm2351_vm13, %v2349_v50 }
 0x94f   : > { %v2516_v52 = vld [vmem:[#allocation2] sm:$0xff]  ;;  %v2525_v56 = vpop.permute.xlu1 %2524 }
 0x950   : > { %2522 = vrot.lane.b32.xlu1 %v2516_v52, %s4591_s23  ;;  %2365 = vmatpush1.msra.mxu0 %v2516_v52 }
 0x951   : > { %4212 = vmatmul.mubr.msk.f32.vlgmr.msra.gmra.mrb[14].mxu0 %vm2360_vm14, %v2356_v51 }
 0x952   : > { %v2518_v53 = vld [vmem:[#allocation2 + $0x10] sm:$0xff]  ;;  %2600 = vmatprep.mubr.f32.mxu0 %v4589_v0 }
 0x953   : > { %2526 = vrot.lane.b32.xlu0 %v2518_v53, %s4591_s23  ;;  %4373 = vmatpush3.msra.mxu1 %v2518_v53 }
 0x954   : > { %2698 = vrot.lane.b32.xlu1 %v2518_v53, %s4592_s24  ;;  %4375 = vmatmul.mubr.msk.f32.vlgmr.msra.gmra.mrb[26].mxu1 %vm2360_vm14, %v2356_v51 }
 0x955   : > { %4377 = vmatprep.subr.mxu1 %v4589_v0  ;;  %4379 = vmatprep.mubr.msk.f32.mxu1 %vm4599_vm4, %v4589_v0 }
 0x957   : > { %2696 = vrot.lane.b32.xlu0 %v2517_v48, %s4592_s24 }
 0x958   : > { %2868 = vrot.lane.b32.xlu1 %v2517_v48, %s4593_s25 }
 0x95b   : > { %2694 = vrot.lane.b32.xlu0 %v2516_v52, %s4592_s24 }
 0x95c   : > { %2866 = vrot.lane.b32.xlu1 %v2516_v52, %s4593_s25 }
 0x95f   : > { %2870 = vrot.lane.b32.xlu0 %v2518_v53, %s4593_s25  ;;  %s4241_s25 = sshll.u32 %s4672_s9, 7  ;;  %s4605_s9 = smov [#allocation5]  }
 0x960   : > { %3042 = vrot.lane.b32.xlu1 %v2518_v53, %s4590_s22  ;;  %s5241_s20 = scalar_lea.hbm %s5291_s8, %s4241_s25  ;;  %s4529_s18 = sshll.u32 %s4605_s9, 4  ;;  %s4530_s18 = int_to_ptr.vmem [resolvable:$false] %s4529_s18 }
 0x961   : > { %s4531_s19 = scalar_lea.vmem %s4530_s18, 256 }
 0x963   : > { %3040 = vrot.lane.b32.xlu0 %v2517_v48, %s4590_s22 }
 0x964   : > { %3212 = vrot.lane.b32.xlu1 %v2517_v48, %s4594_s26 }
 0x967   : > { %3038 = vrot.lane.b32.xlu0 %v2516_v52, %s4590_s22  ;;  %s296_s22 = sand.u32 1, %s4579_s28  }
 0x968   : > { %3210 = vrot.lane.b32.xlu1 %v2516_v52, %s4594_s26  ;;  %s4152_s24 = sshll.u32 %s296_s22, 3  ;;  %s4076_s21 = scalar_lea.sflag [#allocation6], %s296_s22 }
 0x96b   : > { %3214 = vrot.lane.b32.xlu0 %v2518_v53, %s4594_s26  ;;  %s298_s26 = scalar_lea.vmem [#allocation5], %s4152_s24 }
 0x96c   : > { %3386 = vrot.lane.b32.xlu1 %v2518_v53, %s4595_s10 }
 0x96f   : > { %3384 = vrot.lane.b32.xlu0 %v2517_v48, %s4595_s10 }
 0x970   : > { %3556 = vrot.lane.b32.xlu1 %v2517_v48, %s4596_s12 }
 0x973   : > { %3382 = vrot.lane.b32.xlu0 %v2516_v52, %s4595_s10  ;;  %s4089_s10 = sshll.u32 %s298_s26, 4  ;;  %s5243_s10 = int_to_ptr.vmem [resolvable:$true] %s4089_s10 }
 0x974   : > { %3554 = vrot.lane.b32.xlu1 %v2516_v52, %s4596_s12  ;;  %s4525_s17 = scalar_lea.vmem %s5243_s10, 128  ;;  %p4532_p0 = scmp.lt.s32.totalorder %s5243_s10, %s4530_s18 }
 0x975   : > { %p4526_p11 = scmp.ne.s32.totalorder %s5243_s10, %s4525_s17  ;;  %p4533_p1 = scmp.lt.s32.totalorder %s4531_s19, %s4525_s17 }
 0x977   : > { %3558 = vrot.lane.b32.xlu0 %v2518_v53, %s4596_s12  ;;  %p4527_p12 = pnand %p4526_p11, %p4689_p5  ;;  %p4534_p2 = por %p4533_p1, %p4532_p0 }
 0x978   : > { %3730 = vrot.lane.b32.xlu1 %v2518_v53, %s4598_s13 }
 0x979   : > { %p4528_p13 = pneg %p4527_p12 }
 0x97b   : > { %3728 = vrot.lane.b32.xlu0 %v2517_v48, %s4598_s13  ;;  %p4535_p3 = pnand %p4534_p2, %p4528_p13 }
 0x97c   : > { %310 = vperm.xlu1 %4523, %v307_v54  }
 0x97f   : > { %3726 = vrot.lane.b32.xlu0 %v2516_v52, %s4598_s13 }
 0x983   : > { %480 = vperm.xlu0 %4524, %v477_v55  }
 0x9c2   : > { %v2523_v57 = vpop.permute.xlu1 %2522 }
 0x9c3   : > { %v2528_v62 = vsel %vm678_vm6, %v2523_v57, %v2525_v56 }
 0x9c5   : > { %v2527_v59 = vpop.permute.xlu0 %2526 }
 0x9c6   : > { %4378 = vmatpush3.msra.mxu1 %v2527_v59  ;;  %v2699_v60 = vpop.permute.xlu1 %2698  ;;  %v2529_v61 = vsel %vm678_vm6, %v2525_v56, %v2527_v59  ;;  %v3890_v59 = vld [vmem:[%s5290_s7] sm:$0xff]  ;;  %vm4073_vm6 = vcmask 523264  }
 0x9c7   : > { %2536 = vmatprep.subr.mxu0 %v2529_v61  ;;  %4380 = vmatmul.mubr.msk.f32.vlgmr.msra.gmra.mrb[28].mxu1 %vm2360_vm14, %v4214_v58 }
 0x9c8   : > { %4382 = vmatprep.subr.mxu1 %v4589_v0  ;;  %2537 = vmatpush1.msra.mxu0 %v2528_v62  ;;  %v3908_v62 = vld [vmem:[%s5290_s7 + $0x90] sm:$0xff] }
 0x9c9   : > { %4383 = vmatpush3.msra.mxu1 %v2699_v60  ;;  %v2697_v1 = vpop.permute.xlu0 %2696  ;;  %4215 = vmatmul.mubr.msk.f32.vlgmr.msra.gmra.mrb[16].mxu0 %vm2360_vm14, %v4214_v58 }
 0x9ca   : > { %v2869_v2 = vpop.permute.xlu1 %2868  ;;  %v2701_v3 = vsel %vm853_vm5, %v2697_v1, %v2699_v60  ;;  %4384 = vmatprep.mubr.msk.f32.mxu1 %vm4599_vm4, %v4589_v0  ;;  %4387 = vmatprep.subr.mxu1 %v4589_v0  ;;  %v3891_v60 = vld [vmem:[%s5290_s7 + $0x8] sm:$0xff] }
 0x9cb   : > { %2708 = vmatprep.subr.mxu0 %v2701_v3  ;;  %4385 = vmatmul.mubr.msk.f32.vlgmr.msra.gmra.mrb[30].mxu1 %vm2360_vm14, %v4217_v63  ;;  %v4430_v61 = vpack.c.bf16 %v3891_v60, %v3890_v59  ;;  %v3893_v3 = vld [vmem:[%s5290_s7 + $0x18] sm:$0xff] }
 0x9cc   : > { %2772 = vmatprep.mubr.f32.mxu0 %v4589_v0  ;;  %4389 = vmatprep.mubr.msk.f32.mxu1 %vm4599_vm4, %v4589_v0 }
 0x9cd   : > { %v2695_v4 = vpop.permute.xlu0 %2694 }
 0x9ce   : > { %v2700_v5 = vsel %vm853_vm5, %v2695_v4, %v2697_v1  ;;  %v2867_v6 = vpop.permute.xlu1 %2866 }
 0x9cf   : > { %2709 = vmatpush1.msra.mxu0 %v2700_v5  ;;  %v2872_v14 = vsel %vm1028_vm7, %v2867_v6, %v2869_v2  ;;  %v3910_v5 = vld [vmem:[%s5290_s7 + $0xa0] sm:$0xff]  ;;  %v3911_v6 = vld [vmem:[%s5290_s7 + $0xa8] sm:$0xff] }
 0x9d0   : > { %4218 = vmatmul.mubr.msk.f32.vlgmr.msra.gmra.mrb[18].mxu0 %vm2360_vm14, %v4217_v63  ;;  %v3909_v63 = vld [vmem:[%s5290_s7 + $0x98] sm:$0xff] }
 0x9d1   : > { %v2871_v7 = vpop.permute.xlu0 %2870  ;;  %2944 = vmatprep.mubr.f32.mxu0 %v4589_v0  ;;  %v4432_v1 = vpack.c.bf16 %v3909_v63, %v3908_v62 }
 0x9d2   : > { %4388 = vmatpush3.msra.mxu1 %v2871_v7  ;;  %v3043_v9 = vpop.permute.xlu1 %3042  ;;  %v2873_v10 = vsel %vm1028_vm7, %v2869_v2, %v2871_v7  ;;  %v3892_v2 = vld [vmem:[%s5290_s7 + $0x10] sm:$0xff]  ;;  %v4436_v7 = vpack.c.bf16 %v3911_v6, %v3910_v5 }
 0x9d3   : > { %2880 = vmatprep.subr.mxu0 %v2873_v10  ;;  %4392 = vmatprep.subr.mxu1 %v4589_v0  ;;  %v4434_v4 = vpack.c.bf16 %v3893_v3, %v3892_v2 }
 0x9d4   : > { %2881 = vmatpush1.msra.mxu0 %v2872_v14  ;;  %4390 = vmatmul.mubr.msk.f32.vlgmr.msra.gmra.mrb[32].mxu1 %vm2360_vm14, %v4220_v8  ;;  %v3912_v14 = vld [vmem:[%s5290_s7 + $0xb0] sm:$0xff] }
 0x9d5   : > { %4393 = vmatpush3.msra.mxu1 %v3043_v9  ;;  %v3041_v15 = vpop.permute.xlu0 %3040  ;;  %4221 = vmatmul.mubr.msk.f32.vlgmr.msra.gmra.mrb[20].mxu0 %vm2360_vm14, %v4220_v8  ;;  %v3894_v8 = vld [vmem:[%s5290_s7 + $0x20] sm:$0xff] }
 0x9d6   : > { %v3213_v17 = vpop.permute.xlu1 %3212  ;;  %v3045_v18 = vsel %vm322_vm1, %v3041_v15, %v3043_v9  ;;  %4394 = vmatprep.mubr.msk.f32.mxu1 %vm4599_vm4, %v4589_v0  ;;  %4397 = vmatprep.subr.mxu1 %v4589_v0  ;;  %v3895_v9 = vld [vmem:[%s5290_s7 + $0x28] sm:$0xff] }
 0x9d7   : > { %3052 = vmatprep.subr.mxu0 %v3045_v18  ;;  %3116 = vmatprep.mubr.f32.mxu0 %v4589_v0  ;;  %v4438_v10 = vpack.c.bf16 %v3895_v9, %v3894_v8  ;;  %v3897_v18 = vld [vmem:[%s5290_s7 + $0x38] sm:$0xff] }
 0x9d8   : > { %4395 = vmatmul.mubr.msk.f32.vlgmr.msra.gmra.mrb[34].mxu1 %vm2360_vm14, %v4223_v16 }
 0x9d9   : > { %v3039_v19 = vpop.permute.xlu0 %3038  ;;  %4399 = vmatprep.mubr.msk.f32.mxu1 %vm4599_vm4, %v4589_v0 }
 0x9da   : > { %v3044_v20 = vsel %vm322_vm1, %v3039_v19, %v3041_v15  ;;  %v3211_v21 = vpop.permute.xlu1 %3210  ;;  %v3913_v15 = vld [vmem:[%s5290_s7 + $0xb8] sm:$0xff]  ;;  %vm3929_vm1 = vcmask 1045504  }
 0x9db   : > { %3053 = vmatpush1.msra.mxu0 %v3044_v20  ;;  %v3216_v26 = vsel %vm1377_vm8, %v3211_v21, %v3213_v17  ;;  %v3914_v20 = vld [vmem:[%s5290_s7 + $0xc0] sm:$0xff]  ;;  %v3915_v21 = vld [vmem:[%s5290_s7 + $0xc8] sm:$0xff] }
 0x9dc   : > { %4224 = vmatmul.mubr.msk.f32.vlgmr.msra.gmra.mrb[22].mxu0 %vm2360_vm14, %v4223_v16  ;;  %v4440_v16 = vpack.c.bf16 %v3913_v15, %v3912_v14 }
 0x9dd   : > { %v3215_v22 = vpop.permute.xlu0 %3214  ;;  %3288 = vmatprep.mubr.f32.mxu0 %v4589_v0 }
 0x9de   : > { %4398 = vmatpush3.msra.mxu1 %v3215_v22  ;;  %v3387_v24 = vpop.permute.xlu1 %3386  ;;  %v3217_v25 = vsel %vm1377_vm8, %v3213_v17, %v3215_v22  ;;  %v3896_v17 = vld [vmem:[%s5290_s7 + $0x30] sm:$0xff]  ;;  %v4444_v22 = vpack.c.bf16 %v3915_v21, %v3914_v20 }
 0x9df   : > { %3224 = vmatprep.subr.mxu0 %v3217_v25  ;;  %4402 = vmatprep.subr.mxu1 %v4589_v0  ;;  %v4442_v19 = vpack.c.bf16 %v3897_v18, %v3896_v17 }
 0x9e0   : > { %3225 = vmatpush1.msra.mxu0 %v3216_v26  ;;  %4400 = vmatmul.mubr.msk.f32.vlgmr.msra.gmra.mrb[36].mxu1 %vm2360_vm14, %v4226_v23  ;;  %v3916_v26 = vld [vmem:[%s5290_s7 + $0xd0] sm:$0xff] }
 0x9e1   : > { %4403 = vmatpush3.msra.mxu1 %v3387_v24  ;;  %v3385_v27 = vpop.permute.xlu0 %3384  ;;  %4227 = vmatmul.mubr.msk.f32.vlgmr.msra.gmra.mrb[24].mxu0 %vm2360_vm14, %v4226_v23  ;;  %v3898_v23 = vld [vmem:[%s5290_s7 + $0x40] sm:$0xff] }
 0x9e2   : > { %v3557_v29 = vpop.permute.xlu1 %3556  ;;  %v3389_v30 = vsel %vm1552_vm9, %v3385_v27, %v3387_v24  ;;  %4404 = vmatprep.mubr.msk.f32.mxu1 %vm4599_vm4, %v4589_v0  ;;  %4407 = vmatprep.subr.mxu1 %v4589_v0  ;;  %v3899_v24 = vld [vmem:[%s5290_s7 + $0x48] sm:$0xff] }
 0x9e3   : > { %3396 = vmatprep.subr.mxu0 %v3389_v30  ;;  %3460 = vmatprep.mubr.f32.mxu0 %v4589_v0  ;;  %v4446_v25 = vpack.c.bf16 %v3899_v24, %v3898_v23  ;;  %v3901_v30 = vld [vmem:[%s5290_s7 + $0x58] sm:$0xff] }
 0x9e4   : > { %4405 = vmatmul.mubr.msk.f32.vlgmr.msra.gmra.mrb[38].mxu1 %vm2360_vm14, %v4229_v28 }
 0x9e5   : > { %v3383_v32 = vpop.permute.xlu0 %3382  ;;  %4409 = vmatprep.mubr.msk.f32.mxu1 %vm4599_vm4, %v4589_v0 }
 0x9e6   : > { %v3388_v33 = vsel %vm1552_vm9, %v3383_v32, %v3385_v27  ;;  %v3555_v34 = vpop.permute.xlu1 %3554  ;;  %v3917_v27 = vld [vmem:[%s5290_s7 + $0xd8] sm:$0xff] }
 0x9e7   : > { %3397 = vmatpush1.msra.mxu0 %v3388_v33  ;;  %v3560_v39 = vsel %vm1727_vm10, %v3555_v34, %v3557_v29  ;;  %v3918_v33 = vld [vmem:[%s5290_s7 + $0xe0] sm:$0xff]  ;;  %v3919_v34 = vld [vmem:[%s5290_s7 + $0xe8] sm:$0xff] }
 0x9e8   : > { %4230 = vmatmul.mubr.msk.f32.vlgmr.msra.gmra.mrb[26].mxu0 %vm2360_vm14, %v4229_v28  ;;  %v4448_v28 = vpack.c.bf16 %v3917_v27, %v3916_v26 }
 0x9e9   : > { %v3559_v35 = vpop.permute.xlu0 %3558  ;;  %3632 = vmatprep.mubr.f32.mxu0 %v4589_v0 }
 0x9ea   : > { %4408 = vmatpush3.msra.mxu1 %v3559_v35  ;;  %v3731_v37 = vpop.permute.xlu1 %3730  ;;  %v3561_v38 = vsel %vm1727_vm10, %v3557_v29, %v3559_v35  ;;  %v3900_v29 = vld [vmem:[%s5290_s7 + $0x50] sm:$0xff]  ;;  %v4452_v35 = vpack.c.bf16 %v3919_v34, %v3918_v33 }
 0x9eb   : > { %3568 = vmatprep.subr.mxu0 %v3561_v38  ;;  %4412 = vmatprep.subr.mxu1 %v4589_v0  ;;  %v4450_v32 = vpack.c.bf16 %v3901_v30, %v3900_v29 }
 0x9ec   : > { %3569 = vmatpush1.msra.mxu0 %v3560_v39  ;;  %4410 = vmatmul.mubr.msk.f32.vlgmr.msra.gmra.mrb[40].mxu1 %vm2360_vm14, %v4232_v36  ;;  %v3920_v39 = vld [vmem:[%s5290_s7 + $0xf0] sm:$0xff] }
 0x9ed   : > { %4413 = vmatpush3.msra.mxu1 %v3731_v37  ;;  %v3729_v40 = vpop.permute.xlu0 %3728  ;;  %4233 = vmatmul.mubr.msk.f32.vlgmr.msra.gmra.mrb[28].mxu0 %vm2360_vm14, %v4232_v36  ;;  %v3902_v36 = vld [vmem:[%s5290_s7 + $0x60] sm:$0xff] }
 0x9ee   : > { %v3733_v41 = vsel %vm1902_vm11, %v3729_v40, %v3731_v37  ;;  %4414 = vmatprep.mubr.msk.f32.mxu1 %vm4599_vm4, %v4589_v0  ;;  %3804 = vmatprep.mubr.f32.mxu0 %v4589_v0  ;;  %v3903_v37 = vld [vmem:[%s5290_s7 + $0x68] sm:$0xff] }
 0x9ef   : > { %3740 = vmatprep.subr.mxu0 %v3733_v41  ;;  %v4454_v38 = vpack.c.bf16 %v3903_v37, %v3902_v36 }
 0x9f0   : > { %4415 = vmatmul.mubr.msk.f32.vlgmr.msra.gmra.mrb[42].mxu1 %vm2360_vm14, %v4235_v42 }
 0x9f1   : > { %v3727_v43 = vpop.permute.xlu0 %3726  ;;  %4425 = vmatprep.mubr.msk.f32.mxu1 %vm4599_vm4, %v4589_v0  ;;  %vm4604_vm4 = vmmov 1  }
 0x9f2   : > { %v3732_v44 = vsel %vm1902_vm11, %v3727_v43, %v3729_v40  ;;  %v3921_v40 = vld [vmem:[%s5290_s7 + $0xf8] sm:$0xff]  ;;  %vm4465_vm5 = vmpackc.low %vm3929_vm1, %vm4604_vm4 }
 0x9f3   : > { %3741 = vmatpush1.msra.mxu0 %v3732_v44  ;;  %v4456_v41 = vpack.c.bf16 %v3921_v40, %v3920_v39  ;;  %v3905_v43 = vld [vmem:[%s5290_s7 + $0x78] sm:$0xff] }
 0x9f4   : > { %4236 = vmatmul.mubr.msk.f32.vlgmr.msra.gmra.mrb[30].mxu0 %vm2360_vm14, %v4235_v42  ;;  %v3904_v42 = vld [vmem:[%s5290_s7 + $0x70] sm:$0xff] }
 0x9f5   : > { %v4458_v44 = vpack.c.bf16 %v3905_v43, %v3904_v42 }
 0x9fb   : > { %v311_v45 = vpop.permute.xlu1 %310 }
 0x9fc   : > { %v403_v46 = vadd.f32 %v4917_v11, %v311_v45  ;;  %v405_v47 = vadd.f32 %v4919_v12, %v311_v45  ;;  %v474_v48 = vadd.f32 %v4921_v13, %v311_v45  ;;  %v3906_v12 = vld [vmem:[%s5290_s7 + $0x80] sm:$0xff]  ;;  %v3907_v13 = vld [vmem:[%s5290_s7 + $0x88] sm:$0xff] }
 0x9fd   : > { %v4428_v58 = vpack.c.bf16 %v3907_v13, %v3906_v12  ;;  %v3922_v45 = vld [vmem:[%s5290_s7 + $0x100] sm:$0xff] }
 0x9ff   : > { %4429 = vmatprep.subr.bf16.mxu0 %v4428_v58 }
 0xa00   : > { %4431 = vmatpush3.bf16.msra.mxu0 %v4430_v61 }
 0xa01   : > { %4433 = vmatprep.subr.bf16.mxu0 %v4432_v1 }
 0xa02   : > { %v481_v31 = vpop.permute.xlu0 %480 }
 0xa03   : > { %v483_v49 = vadd.f32 %v481_v31, %v403_v46  ;;  %v484_v50 = vadd.f32 %v481_v31, %v405_v47  ;;  %v485_v51 = vadd.f32 %v481_v31, %v474_v48  ;;  %v3923_v46 = vld [vmem:[%s5290_s7 + $0x108] sm:$0xff]  ;;  %v3924_v48 = vld [vmem:[%s5290_s7 + $0x110] sm:$0xff]  ;;  %v3925_v31 = vld [vmem:[%s5290_s7 + $0x118] sm:$0x3f] }
 0xa04   : > { %4435 = vmatpush3.bf16.msra.mxu0 %v4434_v4  ;;  %v4461_v47 = vpack.c.bf16 %v3923_v46, %v3922_v45 }
 0xa05   : > { %489 = vst.msk [vmem:[#allocation4 + $0x10] sm:$0xff] %vm488_vm12, %v485_v51  ;;  %4437 = vmatprep.subr.bf16.mxu0 %v4436_v7 }
 0xa08   : > { %4439 = vmatpush3.bf16.msra.mxu0 %v4438_v10 }
 0xa09   : > { %4441 = vmatprep.subr.bf16.mxu0 %v4440_v16 }
 0xa0c   : > { %v2355_v55 = vld [vmem:[#allocation4 + $0x10] sm:$0xff]  ;;  %4443 = vmatpush3.bf16.msra.mxu0 %v4442_v19 }
 0xa0d   : > { %4445 = vmatprep.subr.bf16.mxu0 %v4444_v22 }
 0xa10   : > { %4447 = vmatpush3.bf16.msra.mxu0 %v4446_v25 }
 0xa11   : > { %4449 = vmatprep.subr.bf16.mxu0 %v4448_v28 }
 0xa14   : > { %4451 = vmatpush3.bf16.msra.mxu0 %v4450_v32 }
 0xa15   : > { %4453 = vmatprep.subr.bf16.mxu0 %v4452_v35 }
 0xa18   : > { %4455 = vmatpush3.bf16.msra.mxu0 %v4454_v38 }
 0xa19   : > { %4457 = vmatprep.subr.bf16.mxu0 %v4456_v41 }
 0xa1c   : > { %4459 = vmatpush3.bf16.msra.mxu0 %v4458_v44 }
 0xa24   : > { %v2430_v52 = vpop.f32.mrb[14].mxu0 }
 0xa25   : > { %v5112_v0 = vadd.f32 %v2430_v52, %v483_v49  ;;  %v2432_v53 = vpop.f32.mrb[15].mxu0  ;;  %v4603_v49 = vmov 0.0|0.0  }
 0xa26   : > { %v5114_v54 = vadd.f32 %v2432_v53, %v484_v50  ;;  %4460 = vmatprep.subr.bf16.mxu1 %v4603_v49  ;;  %v4464_v50 = vpack.c.bf16 %v3925_v31, %v3924_v48 }
 0xa27   : > { %v2501_v56 = vpop.f32.mrb[26].mxu1  ;;  %4462 = vmatpush3.bf16.msra.mxu1 %v4461_v47 }
 0xa28   : > { %v2507_v57 = vadd.f32 %v2501_v56, %v2355_v55  ;;  %v4376_v11 = vpop.f32.mrb[27].mxu1  ;;  %4463 = vmatprep.subr.bf16.mxu1 %v4603_v49 }
 0xa2a   : > { %2510 = vst.msk [vmem:[#allocation4 + $0x10] sm:$0xff] %vm488_vm12, %v2507_v57 }
 0xa2b   : > { %4466 = vmatpush3.bf16.msk.msra.mxu1 %vm4465_vm5, %v4464_v50 }
 0xa31   : > { %v2513_v51 = vld [vmem:[#allocation4 + $0x10] sm:$0xff] }
 0xa9a   : > { %v2673_v52 = vpop.f32.mrb[28].mxu1 }
 0xa9b   : > { %v2679_v53 = vadd.f32 %v2673_v52, %v2513_v51  ;;  %v4381_v55 = vpop.f32.mrb[29].mxu1 }
 0xa9c   : > { %v2602_v56 = vpop.f32.mrb[16].mxu0 }
 0xa9d   : > { %2682 = vst.msk [vmem:[#allocation4 + $0x10] sm:$0xff] %vm488_vm12, %v2679_v53  ;;  %v2677_v57 = vadd.f32 %v2602_v56, %v5112_v0  ;;  %v2604_v11 = vpop.f32.mrb[17].mxu0 }
 0xa9e   : > { %v2678_v12 = vadd.f32 %v2604_v11, %v5114_v54  ;;  %v2845_v13 = vpop.f32.mrb[30].mxu1 }
 0xa9f   : > { %v4386_v58 = vpop.f32.mrb[31].mxu1 }
 0xaa3   : > { %v2774_v59 = vpop.f32.mrb[18].mxu0 }
 0xaa4   : > { %v2685_v60 = vld [vmem:[#allocation4 + $0x10] sm:$0xff]  ;;  %v2849_v61 = vadd.f32 %v2774_v59, %v2677_v57  ;;  %v2776_v62 = vpop.f32.mrb[19].mxu0 }
 0xaa5   : > { %v2851_v63 = vadd.f32 %v2845_v13, %v2685_v60  ;;  %v2850_v1 = vadd.f32 %v2776_v62, %v2678_v12 }
 0xaa7   : > { %2854 = vst.msk [vmem:[#allocation4 + $0x10] sm:$0xff] %vm488_vm12, %v2851_v63  ;;  %v3017_v2 = vpop.f32.mrb[32].mxu1 }
 0xaa8   : > { %v2946_v3 = vpop.f32.mrb[20].mxu0  ;;  %v4391_v4 = vpop.f32.mrb[33].mxu1 }
 0xaa9   : > { %v3021_v5 = vadd.f32 %v2946_v3, %v2849_v61  ;;  %v2948_v6 = vpop.f32.mrb[21].mxu0 }
 0xaaa   : > { %v3022_v7 = vadd.f32 %v2948_v6, %v2850_v1 }
 0xaab   : > { %v3189_v0 = vpop.f32.mrb[34].mxu1 }
 0xaac   : > { %v4396_v8 = vpop.f32.mrb[35].mxu1 }
 0xaae   : > { %v2857_v9 = vld [vmem:[#allocation4 + $0x10] sm:$0xff] }
 0xaaf   : > { %v3023_v54 = vadd.f32 %v3017_v2, %v2857_v9  ;;  %v3118_v10 = vpop.f32.mrb[22].mxu0 }
 0xab0   : > { %v3193_v14 = vadd.f32 %v3118_v10, %v3021_v5  ;;  %v3120_v15 = vpop.f32.mrb[23].mxu0 }
 0xab1   : > { %3026 = vst.msk [vmem:[#allocation4 + $0x10] sm:$0xff] %vm488_vm12, %v3023_v54  ;;  %v3194_v16 = vadd.f32 %v3120_v15, %v3022_v7 }
 0xab3   : > { %v3361_v17 = vpop.f32.mrb[36].mxu1 }
 0xab4   : > { %v3290_v18 = vpop.f32.mrb[24].mxu0  ;;  %v4401_v19 = vpop.f32.mrb[37].mxu1 }
 0xab5   : > { %v3365_v20 = vadd.f32 %v3290_v18, %v3193_v14  ;;  %v3292_v21 = vpop.f32.mrb[25].mxu0 }
 0xab6   : > { %v3366_v22 = vadd.f32 %v3292_v21, %v3194_v16 }
 0xab7   : > { %v3533_v23 = vpop.f32.mrb[38].mxu1 }
 0xab8   : > { %v3029_v24 = vld [vmem:[#allocation4 + $0x10] sm:$0xff]  ;;  %v4406_v25 = vpop.f32.mrb[39].mxu1 }
 0xab9   : > { %v3195_v26 = vadd.f32 %v3189_v0, %v3029_v24 }
 0xabb   : > { %3198 = vst.msk [vmem:[#allocation4 + $0x10] sm:$0xff] %vm488_vm12, %v3195_v26  ;;  %v3462_v27 = vpop.f32.mrb[26].mxu0 }
 0xabc   : > { %v3537_v28 = vadd.f32 %v3462_v27, %v3365_v20  ;;  %v3464_v29 = vpop.f32.mrb[27].mxu0 }
 0xabd   : > { %v3538_v30 = vadd.f32 %v3464_v29, %v3366_v22 }
 0xabf   : > { %v3705_v32 = vpop.f32.mrb[40].mxu1 }
 0xac0   : > { %v3634_v33 = vpop.f32.mrb[28].mxu0  ;;  %v4411_v34 = vpop.f32.mrb[41].mxu1 }
 0xac1   : > { %v3709_v35 = vadd.f32 %v3634_v33, %v3537_v28  ;;  %v3636_v36 = vpop.f32.mrb[29].mxu0 }
 0xac2   : > { %v3201_v37 = vld [vmem:[#allocation4 + $0x10] sm:$0xff]  ;;  %v3710_v38 = vadd.f32 %v3636_v36, %v3538_v30 }
 0xac3   : > { %v3367_v39 = vadd.f32 %v3361_v17, %v3201_v37  ;;  %v3877_v40 = vpop.f32.mrb[42].mxu1 }
 0xac4   : > { %v4416_v41 = vpop.f32.mrb[43].mxu1 }
 0xac5   : > { %3370 = vst.msk [vmem:[#allocation4 + $0x10] sm:$0xff] %vm488_vm12, %v3367_v39 }
 0xac7   : > { %v3806_v42 = vpop.f32.mrb[30].mxu0 }
 0xac8   : > { %v3881_v43 = vadd.f32 %v3806_v42, %v3709_v35  ;;  %v3808_v44 = vpop.f32.mrb[31].mxu0 }
 0xac9   : > { %v3882_v45 = vadd.f32 %v3808_v44, %v3710_v38 }
 0xacb   : > { %3997 = vmatprep.mubr.f32.mxu0 %v3882_v45 }
 0xacc   : > { %v3373_v46 = vld [vmem:[#allocation4 + $0x10] sm:$0xff]  ;;  %3998 = vmatmul.mubr.f32.vlgmr.msra.gmra.mrb[32].mxu0 %v3881_v43 }
 0xacd   : > { %v3539_v47 = vadd.f32 %v3533_v23, %v3373_v46 }
 0xacf   : > { %3542 = vst.msk [vmem:[#allocation4 + $0x10] sm:$0xff] %vm488_vm12, %v3539_v47 }
 0xad6   : > { %v3545_v48 = vld [vmem:[#allocation4 + $0x10] sm:$0xff] }
 0xad7   : > { %v3711_v31 = vadd.f32 %v3705_v32, %v3545_v48 }
 0xad9   : > { %3714 = vst.msk [vmem:[#allocation4 + $0x10] sm:$0xff] %vm488_vm12, %v3711_v31 }
 0xae0   : > { %v3717_v49 = vld [vmem:[#allocation4 + $0x10] sm:$0xff] }
 0xae1   : > { %v3883_v50 = vadd.f32 %v3877_v40, %v3717_v49 }
 0xae3   : > { %3886 = vst.msk [vmem:[#allocation4 + $0x10] sm:$0xff] %vm488_vm12, %v3883_v50 }
 0xaea   : > { %v3889_v51 = vld [vmem:[#allocation4 + $0x10] sm:$0xff] }
 0xaeb   : > { %4426 = vmatmul.mubr.msk.f32.vlgmr.msra.gmra.mrb[44].mxu1 %vm488_vm12, %v3889_v51 }
 0xb9f   : > { %v4314_v52 = vpop.f32.mrb[32].mxu0 }
 0xba0   : > { %v4315_v53 = vpop.f32.mrb[33].mxu0 }
 0xba1   : > { %v4316_v55 = vadd.f32 %v4315_v53, %v4314_v52 }
 0xbbe   : > { %v4069_v56 = vpop.f32.mrb[44].mxu1 }
 0xbbf   : > { %v4427_v57 = vpop.f32.mrb[45].mxu1  ;;  %v4070_v11 = vadd.f32 %v4316_v55, %v4069_v56 }
 0xbc1   : > { %4074 = vst.msk [vmem:[%s298_s26] sm:$0xff] %vm4073_vm6, %v4070_v11 }
 0xbc2   : > { %4538 = shalt.err (!%p4535_p3)
}
 0xbc3   : > { %s4539_s23 = scalar_lea.hbm %s5241_s20, 128  ;;  %s4543_s25 = scalar_lea.hbm %s5291_s8, 256 }
 0xbc4   : > { %p4540_p4 = scmp.ne.s32.totalorder %s5241_s20, %s4539_s23  ;;  %p4544_p9 = scmp.lt.u32.totalorder %s5241_s20, %s5291_s8 }
 0xbc5   : > { %p4545_p10 = scmp.lt.u32.totalorder %s4543_s25, %s4539_s23  ;;  %p4547_p12 = scmp.lt.u32.totalorder %s4539_s23, %s5241_s20 }
 0xbc6   : > { %p4541_p7 = pnand %p4540_p4, %p4689_p5 }
 0xbc7   : > { %p4546_p11 = por %p4545_p10, %p4544_p9 }
 0xbc8   : > { %p4542_p8 = pneg %p4541_p7 }
 0xbc9   : > { %p4548_p13 = por %p4547_p12, %p4546_p11 }
 0xbcb   : > { %p4549_p0 = pnand %p4548_p13, %p4542_p8 }
 0xbcd   : > { %4552 = shalt.err (!%p4549_p0)
}
 0xbce   : > { %4468 = dma.vmem_to_hbm [thread:$0]  (%p4689_p5), %s5243_s10, 128, %s5241_s20, %s4076_s21  }
 0xbcf PF: > { %p4474_p1 = scmp.ge.s32.totalorder %s4587_s30, 2  ;;  %s4101_s13 = sand.u32 1, %s4575_s27  }
 0xbd0   : > { %s4102_s17 = scalar_lea.sflag [#allocation6], %s4101_s13 }
 0xbd1   : > { %p4471_p2 = pnand %p4474_p1, %p4693_p6 }
 0xbd3   : > { %4570 = dma.done.wait (!%p4471_p2), %s4102_s17, 128  }
 0xbd4   : > { %4572 = vsyncadd (!%p4471_p2), %s4102_s17, 4294967168  ;;  %p18_p3 = scmp.ge.s32.totalorder %s4676_s11, 4   ;;  %s5294_s27 = smov %s4579_s28 }
 0xbd5   : > { %s5295_s28 = smov %s4583_s29  ;;  %s5296_s29 = smov %s4687_s14 }
 0xbd6   : > { %s5297_s30 = smov %s4676_s11  ;;  %20 = sbr.rel (!%p18_p3) target bundleno = 3 (0x3), region = 103 }
 0xbdd   :  { %4107 = vsyncpa [#allocation6], 1 }
 0xbde   :  { %4109 = vsyncpa [#allocation6 + $0x1], 1 }

</bundles_post_ra>
